<compile_context>
chip_gen: v7x
topology: tpu7x:2x2x1
jax: 0.10.0
libtpu: 0.0.40
codegen_flags: <defaults>
</compile_context>

<pallas_src>
import functools

import jax
import jax.numpy as jnp
from jax.experimental import pallas as pl
from jax.experimental.pallas import tpu as pltpu


# ---------------------------------------------------------------------------
# Pallas kernels
# ---------------------------------------------------------------------------
def conv_bn_relu_kernel(xe_ref, xo_ref, w_ref, scale_ref, bias_ref, o_ref, *, k_size):
    """Stride-2 'valid' Conv1d + folded BatchNorm + ReLU, one sample / one Cout tile.

    xe_ref/xo_ref: (Lout + K//2 - 1, Cin)   even / odd input rows, bf16
    w_ref:         (K, Cin, tc)             conv taps, bf16
    scale_ref:     (1, tc)   bias_ref: (1, tc)   folded-BN scale / bias, f32
    o_ref:         (Lout, tc)               bf16 output tile
    """
    lout = o_ref.shape[0]
    cin = xe_ref.shape[1]
    acc = None
    for k in range(k_size):                         # K=4, static unroll
        src = xe_ref if k % 2 == 0 else xo_ref      # tap k lives at row k//2 of its stream
        off = k // 2
        xk = src[off:off + lout, :]                 # (Lout, Cin) contiguous static slice
        wk = w_ref[k]                               # (Cin, tc)
        if cin == 1:
            # Layer 1: Cin*K is tiny -> outer product on the VPU, keep the MXU out of it.
            part = xk.astype(jnp.float32) * wk.astype(jnp.float32)
        else:
            part = jnp.dot(xk, wk, preferred_element_type=jnp.float32)
        acc = part if acc is None else acc + part
    y = acc * scale_ref[...] + bias_ref[...]        # f32 epilogue (v5e-safe)
    o_ref[...] = jnp.maximum(y, 0.0).astype(o_ref.dtype)


def maxpool_s2_kernel(xe_ref, xo_ref, o_ref, *, half_k):
    """MaxPool1d(kernel=2*half_k, stride=2) over even/odd row streams.
    Pure VPU maximum tree + one full-tile store."""
    lout = o_ref.shape[0]
    m = jnp.maximum(xe_ref[0:lout, :], xo_ref[0:lout, :])
    for i in range(1, half_k):                      # half_k=4, static unroll
        m = jnp.maximum(m, jnp.maximum(xe_ref[i:i + lout, :], xo_ref[i:i + lout, :]))
    o_ref[...] = m


def linear_sigmoid_kernel(x_ref, w_ref, b_ref, o_ref):
    """sigmoid(x @ w^T + b) with out_features == 1: VPU multiply + lane reduction
    (avoids a 1-column MXU matmul)."""
    x = x_ref[...].astype(jnp.float32)              # bf16 activations -> f32 math
    s = jnp.sum(x * w_ref[...], axis=1, keepdims=True) + b_ref[...]
    o_ref[...] = jax.nn.sigmoid(s)


# ---------------------------------------------------------------------------
# Wrappers around pallas_call
# ---------------------------------------------------------------------------
def _split_even_odd(x_blc, n_rows):
    """(B, L, C) -> even rows 0,2,... and odd rows 1,3,..., n_rows each.
    One strided HBM pass (same total bytes as x) instead of a 4x im2col blow-up."""
    xe = x_blc[:, 0:2 * n_rows:2, :]
    xo = x_blc[:, 1:2 * n_rows + 1:2, :]
    return xe, xo


def conv1d_bn_relu(x_blc, layer, *, eps=1e-5):
    """Conv1d(K, stride=2, valid) + BatchNorm1d(eval stats) + ReLU, channels-last."""
    w, b, gamma, beta, mean, var = layer            # w: (Cout, Cin, K) PyTorch layout
    Cout, Cin, K = w.shape
    B, L, _ = x_blc.shape
    Lout = (L - K) // 2 + 1
    n_rows = Lout + K // 2 - 1                      # rows needed per even/odd stream

    xe, xo = _split_even_odd(x_blc, n_rows)
    w_kcn = jnp.transpose(w, (2, 1, 0)).astype(jnp.bfloat16)   # (K, Cin, Cout) bf16
    bn_scale = (gamma / jnp.sqrt(var + eps)).reshape(1, Cout)
    eff_bias = ((b - mean) * bn_scale[0] + beta).reshape(1, Cout)

    tc = 128 if Cout % 128 == 0 else Cout           # lane-aligned Cout tiles
    kern = functools.partial(conv_bn_relu_kernel, k_size=K)
    return pl.pallas_call(
        kern,
        out_shape=jax.ShapeDtypeStruct((B, Lout, Cout), jnp.bfloat16),
        grid=(B, Cout // tc),
        in_specs=[
            pl.BlockSpec((None, n_rows, Cin), lambda bi, j: (bi, 0, 0)),
            pl.BlockSpec((None, n_rows, Cin), lambda bi, j: (bi, 0, 0)),
            pl.BlockSpec((K, Cin, tc), lambda bi, j: (0, 0, j)),
            pl.BlockSpec((1, tc), lambda bi, j: (0, j)),
            pl.BlockSpec((1, tc), lambda bi, j: (0, j)),
        ],
        out_specs=pl.BlockSpec((None, Lout, tc), lambda bi, j: (bi, 0, j)),
        compiler_params=pltpu.CompilerParams(
            dimension_semantics=("parallel", "parallel")),
    )(xe, xo, w_kcn, bn_scale, eff_bias)


def maxpool1d_s2(x_blc, pool_k):
    """MaxPool1d(kernel=pool_k, stride=2), channels-last, grid over batch."""
    B, L, C = x_blc.shape
    Lout = (L - pool_k) // 2 + 1
    n_rows = Lout + pool_k // 2 - 1
    xe, xo = _split_even_odd(x_blc, n_rows)
    kern = functools.partial(maxpool_s2_kernel, half_k=pool_k // 2)
    return pl.pallas_call(
        kern,
        out_shape=jax.ShapeDtypeStruct((B, Lout, C), x_blc.dtype),
        grid=(B,),
        in_specs=[pl.BlockSpec((None, n_rows, C), lambda bi: (bi, 0, 0)),
                  pl.BlockSpec((None, n_rows, C), lambda bi: (bi, 0, 0))],
        out_specs=pl.BlockSpec((None, Lout, C), lambda bi: (bi, 0, 0)),
        compiler_params=pltpu.CompilerParams(dimension_semantics=("parallel",)),
    )(xe, xo)


def linear_sigmoid(flat, w_row, bias):
    """(B, F) bf16 x (1, F) f32 -> sigmoid(B, 1).  Small head, single block."""
    B, F = flat.shape
    return pl.pallas_call(
        linear_sigmoid_kernel,
        out_shape=jax.ShapeDtypeStruct((B, 1), jnp.float32),
        grid=(1,),
        in_specs=[pl.BlockSpec((B, F), lambda i: (0, 0)),
                  pl.BlockSpec((1, F), lambda i: (0, 0)),
                  pl.BlockSpec((1, 1), lambda i: (0, 0))],
        out_specs=pl.BlockSpec((B, 1), lambda i: (0, 0)),
    )(flat, w_row, bias)


# ---------------------------------------------------------------------------
# Forward pass (eval semantics; Dropout(0.2) is identity)
# ---------------------------------------------------------------------------
def cnn_forward(x, params):
    # x: (B, L) f32  ->  channels-last (B, L, 1), bf16 MXU/DMA operands.
    x = x.astype(jnp.bfloat16)[:, :, None]
    x = conv1d_bn_relu(x, params["c1"])             # (B, L1, 64)
    x = conv1d_bn_relu(x, params["c2"])             # (B, L2, 128)
    x = conv1d_bn_relu(x, params["c3"])             # (B, L3, 256)
    x = maxpool1d_s2(x, pool_k=8)                   # (B, L4, 256)

    B, L4, C = x.shape
    flat = x.reshape(B, L4 * C)                     # channels-last flatten (no transpose);
    w_row, b_lin = params["fc"]                     # fc weight was permuted once at init.
    return linear_sigmoid(flat, w_row, b_lin)       # (B, 1) in [0, 1]


# ---------------------------------------------------------------------------
# Deterministic parameter init (classifier sized to the synthetic input length
# instead of the hard-coded 181248 of the original module).
# ---------------------------------------------------------------------------
def out_len(L, k, s):
    return (L - k) // s + 1


def init_params(key, in_len):
    def conv_layer(k, cin, cout, K):
        kw, kb, k1, k2, k3, k4 = jax.random.split(k, 6)
        w = jax.random.normal(kw, (cout, cin, K), jnp.float32) / jnp.sqrt(cin * K)
        b = 0.05 * jax.random.normal(kb, (cout,), jnp.float32)
        gamma = 1.0 + 0.1 * jax.random.normal(k1, (cout,), jnp.float32)
        beta = 0.1 * jax.random.normal(k2, (cout,), jnp.float32)
        mean = 0.1 * jax.random.normal(k3, (cout,), jnp.float32)
        var = 1.0 + 0.1 * jax.random.uniform(k4, (cout,), jnp.float32)
        return (w, b, gamma, beta, mean, var)

    k1, k2, k3, k4 = jax.random.split(key, 4)
    L1 = out_len(in_len, 4, 2)
    L2 = out_len(L1, 4, 2)
    L3 = out_len(L2, 4, 2)
    L4 = out_len(L3, 8, 2)
    C = 256
    feat = C * L4

    kfw, kfb = jax.random.split(k4)
    # Weight is created in PyTorch flatten order (c*L4 + t) and permuted ONCE to the
    # channels-last order (t*C + c) used by this pipeline — exactly what must be done
    # if real nn.Linear weights (shape (1, feat)) were loaded.
    w_pt = jax.random.normal(kfw, (feat,), jnp.float32) / jnp.sqrt(feat)
    w_cl = w_pt.reshape(C, L4).T.reshape(1, feat)
    b_lin = 0.05 * jax.random.normal(kfb, (1, 1), jnp.float32)

    return {
        "c1": conv_layer(k1, 1, 64, 4),
        "c2": conv_layer(k2, 64, 128, 4),
        "c3": conv_layer(k3, 128, 256, 4),
        "fc": (w_cl, b_lin),
    }


if __name__ == "__main__":
    B, L = 2, 128   # small synthetic shapes: L=128 -> L1=63, L2=30, L3=14, L4=4, feat=1024
    key = jax.random.PRNGKey(0)
    kx, kp = jax.random.split(key)
    x = jax.random.normal(kx, (B, L), jnp.float32)
    params = init_params(kp, L)

    out = jax.jit(cnn_forward)(x, params)
    out = jax.block_until_ready(out)
    assert out.shape == (B, 1)
    assert bool(jnp.all((out >= 0.0) & (out <= 1.0)))
    print("KERNEL_OK")
</pallas_src>

<mosaic_0001>
module attributes {stable_mosaic.version = 11 : i64} {
  func.func @conv_bn_relu_kernel(%arg0: i32, %arg1: i32, %arg2: memref<1x64x1xbf16, #tpu.memory_space<vmem>>, %arg3: memref<1x64x1xbf16, #tpu.memory_space<vmem>>, %arg4: memref<4x1x64xbf16, #tpu.memory_space<vmem>>, %arg5: memref<1x64xf32, #tpu.memory_space<vmem>>, %arg6: memref<1x64xf32, #tpu.memory_space<vmem>>, %arg7: memref<1x63x64xbf16, #tpu.memory_space<vmem>>) attributes {dimension_semantics = [#tpu.dimension_semantics<parallel>, #tpu.dimension_semantics<parallel>], iteration_bounds = array<i64: 2, 1>, scalar_prefetch = 0 : i64, scratch_operands = 0 : i64, tpu.core_type = #tpu.core_type<tc>, window_params = [{transform_indices = @transform_0, window_bounds = array<i64: 1, 64, 1>}, {transform_indices = @transform_1, window_bounds = array<i64: 1, 64, 1>}, {transform_indices = @transform_2, window_bounds = array<i64: 4, 1, 64>}, {transform_indices = @transform_3, window_bounds = array<i64: 1, 64>}, {transform_indices = @transform_4, window_bounds = array<i64: 1, 64>}, {transform_indices = @transform_5, window_bounds = array<i64: 1, 63, 64>}]} {
    %c0 = arith.constant 0 : index
    %c0_0 = arith.constant 0 : index
    %c0_1 = arith.constant 0 : index
    %0 = vector.load %arg2[%c0, %c0_0, %c0_1] : memref<1x64x1xbf16, #tpu.memory_space<vmem>>, vector<1x63x1xbf16>
    %1 = vector.shape_cast %0 : vector<1x63x1xbf16> to vector<63x1xbf16>
    %c0_2 = arith.constant 0 : index
    %c0_3 = arith.constant 0 : index
    %c0_4 = arith.constant 0 : index
    %2 = vector.load %arg4[%c0_2, %c0_3, %c0_4] : memref<4x1x64xbf16, #tpu.memory_space<vmem>>, vector<1x1x64xbf16>
    %3 = vector.shape_cast %2 : vector<1x1x64xbf16> to vector<1x64xbf16>
    %4 = arith.extf %1 : vector<63x1xbf16> to vector<63x1xf32>
    %5 = arith.extf %3 : vector<1x64xbf16> to vector<1x64xf32>
    %6 = vector.broadcast %4 : vector<63x1xf32> to vector<63x64xf32>
    %7 = vector.broadcast %5 : vector<1x64xf32> to vector<63x64xf32>
    %8 = arith.mulf %6, %7 : vector<63x64xf32>
    %c0_5 = arith.constant 0 : index
    %c0_6 = arith.constant 0 : index
    %c0_7 = arith.constant 0 : index
    %9 = vector.load %arg3[%c0_5, %c0_6, %c0_7] : memref<1x64x1xbf16, #tpu.memory_space<vmem>>, vector<1x63x1xbf16>
    %10 = vector.shape_cast %9 : vector<1x63x1xbf16> to vector<63x1xbf16>
    %c1 = arith.constant 1 : index
    %c0_8 = arith.constant 0 : index
    %c0_9 = arith.constant 0 : index
    %11 = vector.load %arg4[%c1, %c0_8, %c0_9] : memref<4x1x64xbf16, #tpu.memory_space<vmem>>, vector<1x1x64xbf16>
    %12 = vector.shape_cast %11 : vector<1x1x64xbf16> to vector<1x64xbf16>
    %13 = arith.extf %10 : vector<63x1xbf16> to vector<63x1xf32>
    %14 = arith.extf %12 : vector<1x64xbf16> to vector<1x64xf32>
    %15 = vector.broadcast %13 : vector<63x1xf32> to vector<63x64xf32>
    %16 = vector.broadcast %14 : vector<1x64xf32> to vector<63x64xf32>
    %17 = arith.mulf %15, %16 : vector<63x64xf32>
    %18 = arith.addf %8, %17 : vector<63x64xf32>
    %c0_10 = arith.constant 0 : index
    %c1_11 = arith.constant 1 : index
    %c0_12 = arith.constant 0 : index
    %19 = vector.load %arg2[%c0_10, %c1_11, %c0_12] : memref<1x64x1xbf16, #tpu.memory_space<vmem>>, vector<1x63x1xbf16>
    %20 = vector.shape_cast %19 : vector<1x63x1xbf16> to vector<63x1xbf16>
    %c2 = arith.constant 2 : index
    %c0_13 = arith.constant 0 : index
    %c0_14 = arith.constant 0 : index
    %21 = vector.load %arg4[%c2, %c0_13, %c0_14] : memref<4x1x64xbf16, #tpu.memory_space<vmem>>, vector<1x1x64xbf16>
    %22 = vector.shape_cast %21 : vector<1x1x64xbf16> to vector<1x64xbf16>
    %23 = arith.extf %20 : vector<63x1xbf16> to vector<63x1xf32>
    %24 = arith.extf %22 : vector<1x64xbf16> to vector<1x64xf32>
    %25 = vector.broadcast %23 : vector<63x1xf32> to vector<63x64xf32>
    %26 = vector.broadcast %24 : vector<1x64xf32> to vector<63x64xf32>
    %27 = arith.mulf %25, %26 : vector<63x64xf32>
    %28 = arith.addf %18, %27 : vector<63x64xf32>
    %c0_15 = arith.constant 0 : index
    %c1_16 = arith.constant 1 : index
    %c0_17 = arith.constant 0 : index
    %29 = vector.load %arg3[%c0_15, %c1_16, %c0_17] : memref<1x64x1xbf16, #tpu.memory_space<vmem>>, vector<1x63x1xbf16>
    %30 = vector.shape_cast %29 : vector<1x63x1xbf16> to vector<63x1xbf16>
    %c3 = arith.constant 3 : index
    %c0_18 = arith.constant 0 : index
    %c0_19 = arith.constant 0 : index
    %31 = vector.load %arg4[%c3, %c0_18, %c0_19] : memref<4x1x64xbf16, #tpu.memory_space<vmem>>, vector<1x1x64xbf16>
    %32 = vector.shape_cast %31 : vector<1x1x64xbf16> to vector<1x64xbf16>
    %33 = arith.extf %30 : vector<63x1xbf16> to vector<63x1xf32>
    %34 = arith.extf %32 : vector<1x64xbf16> to vector<1x64xf32>
    %35 = vector.broadcast %33 : vector<63x1xf32> to vector<63x64xf32>
    %36 = vector.broadcast %34 : vector<1x64xf32> to vector<63x64xf32>
    %37 = arith.mulf %35, %36 : vector<63x64xf32>
    %38 = arith.addf %28, %37 : vector<63x64xf32>
    %c0_20 = arith.constant 0 : index
    %c0_21 = arith.constant 0 : index
    %39 = vector.load %arg5[%c0_20, %c0_21] : memref<1x64xf32, #tpu.memory_space<vmem>>, vector<1x64xf32>
    %40 = vector.broadcast %39 : vector<1x64xf32> to vector<63x64xf32>
    %41 = arith.mulf %38, %40 : vector<63x64xf32>
    %c0_22 = arith.constant 0 : index
    %c0_23 = arith.constant 0 : index
    %42 = vector.load %arg6[%c0_22, %c0_23] : memref<1x64xf32, #tpu.memory_space<vmem>>, vector<1x64xf32>
    %43 = vector.broadcast %42 : vector<1x64xf32> to vector<63x64xf32>
    %44 = arith.addf %41, %43 : vector<63x64xf32>
    %cst = arith.constant 0.000000e+00 : f32
    %45 = vector.broadcast %cst : f32 to vector<63x64xf32>
    %46 = arith.maximumf %44, %45 : vector<63x64xf32>
    %47 = arith.truncf %46 : vector<63x64xf32> to vector<63x64xbf16>
    %c0_24 = arith.constant 0 : index
    %c0_25 = arith.constant 0 : index
    %c0_26 = arith.constant 0 : index
    %48 = vector.load %arg7[%c0_24, %c0_25, %c0_26] : memref<1x63x64xbf16, #tpu.memory_space<vmem>>, vector<1x63x64xbf16>
    %49 = vector.shape_cast %48 : vector<1x63x64xbf16> to vector<63x64xbf16>
    %50 = vector.shape_cast %47 : vector<63x64xbf16> to vector<1x63x64xbf16>
    tpu.vector_store %arg7[%c0_24, %c0_25, %c0_26], %50 {strides = array<i32>} : memref<1x63x64xbf16, #tpu.memory_space<vmem>>, vector<1x63x64xbf16>,
    return
  }
  func.func @transform_0(%arg0: i32, %arg1: i32) -> (i32, i32, i32) {
    %c0_i32 = arith.constant 0 : i32
    %c0_i32_0 = arith.constant 0 : i32
    %c0_i32_1 = arith.constant 0 : i32
    return %arg0, %c0_i32, %c0_i32_0 : i32, i32, i32
  }
  func.func @transform_1(%arg0: i32, %arg1: i32) -> (i32, i32, i32) {
    %c0_i32 = arith.constant 0 : i32
    %c0_i32_0 = arith.constant 0 : i32
    %c0_i32_1 = arith.constant 0 : i32
    return %arg0, %c0_i32, %c0_i32_0 : i32, i32, i32
  }
  func.func @transform_2(%arg0: i32, %arg1: i32) -> (i32, i32, i32) {
    %c0_i32 = arith.constant 0 : i32
    %c0_i32_0 = arith.constant 0 : i32
    %c0_i32_1 = arith.constant 0 : i32
    return %c0_i32, %c0_i32_0, %arg1 : i32, i32, i32
  }
  func.func @transform_3(%arg0: i32, %arg1: i32) -> (i32, i32) {
    %c0_i32 = arith.constant 0 : i32
    %c0_i32_0 = arith.constant 0 : i32
    return %c0_i32, %arg1 : i32, i32
  }
  func.func @transform_4(%arg0: i32, %arg1: i32) -> (i32, i32) {
    %c0_i32 = arith.constant 0 : i32
    %c0_i32_0 = arith.constant 0 : i32
    return %c0_i32, %arg1 : i32, i32
  }
  func.func @transform_5(%arg0: i32, %arg1: i32) -> (i32, i32, i32) {
    %c0_i32 = arith.constant 0 : i32
    %c0_i32_0 = arith.constant 0 : i32
    return %arg0, %c0_i32, %arg1 : i32, i32, i32
  }
}

module attributes {stable_mosaic.version = 11 : i64} {
  func.func @conv_bn_relu_kernel(%arg0: i32, %arg1: i32, %arg2: memref<1x31x64xbf16, #tpu.memory_space<vmem>>, %arg3: memref<1x31x64xbf16, #tpu.memory_space<vmem>>, %arg4: memref<4x64x128xbf16, #tpu.memory_space<vmem>>, %arg5: memref<1x128xf32, #tpu.memory_space<vmem>>, %arg6: memref<1x128xf32, #tpu.memory_space<vmem>>, %arg7: memref<1x30x128xbf16, #tpu.memory_space<vmem>>) attributes {dimension_semantics = [#tpu.dimension_semantics<parallel>, #tpu.dimension_semantics<parallel>], iteration_bounds = array<i64: 2, 1>, scalar_prefetch = 0 : i64, scratch_operands = 0 : i64, tpu.core_type = #tpu.core_type<tc>, window_params = [{transform_indices = @transform_0, window_bounds = array<i64: 1, 31, 64>}, {transform_indices = @transform_1, window_bounds = array<i64: 1, 31, 64>}, {transform_indices = @transform_2, window_bounds = array<i64: 4, 64, 128>}, {transform_indices = @transform_3, window_bounds = array<i64: 1, 128>}, {transform_indices = @transform_4, window_bounds = array<i64: 1, 128>}, {transform_indices = @transform_5, window_bounds = array<i64: 1, 30, 128>}]} {
    %c0 = arith.constant 0 : index
    %c0_0 = arith.constant 0 : index
    %c0_1 = arith.constant 0 : index
    %0 = vector.load %arg2[%c0, %c0_0, %c0_1] : memref<1x31x64xbf16, #tpu.memory_space<vmem>>, vector<1x30x64xbf16>
    %1 = vector.shape_cast %0 : vector<1x30x64xbf16> to vector<30x64xbf16>
    %c0_2 = arith.constant 0 : index
    %c0_3 = arith.constant 0 : index
    %c0_4 = arith.constant 0 : index
    %2 = vector.load %arg4[%c0_2, %c0_3, %c0_4] : memref<4x64x128xbf16, #tpu.memory_space<vmem>>, vector<1x64x128xbf16>
    %3 = vector.shape_cast %2 : vector<1x64x128xbf16> to vector<64x128xbf16>
    %cst = arith.constant dense<0.000000e+00> : vector<30x128xf32>
    %4 = tpu.matmul %1, %3, %cst {dimension_numbers = #tpu.dot_dimension_numbers<[1], [0], [0], [1], [0, 0, 1, 1], [], []>} : vector<30x64xbf16>, vector<64x128xbf16>, vector<30x128xf32> -> vector<30x128xf32>
    %c0_5 = arith.constant 0 : index
    %c0_6 = arith.constant 0 : index
    %c0_7 = arith.constant 0 : index
    %5 = vector.load %arg3[%c0_5, %c0_6, %c0_7] : memref<1x31x64xbf16, #tpu.memory_space<vmem>>, vector<1x30x64xbf16>
    %6 = vector.shape_cast %5 : vector<1x30x64xbf16> to vector<30x64xbf16>
    %c1 = arith.constant 1 : index
    %c0_8 = arith.constant 0 : index
    %c0_9 = arith.constant 0 : index
    %7 = vector.load %arg4[%c1, %c0_8, %c0_9] : memref<4x64x128xbf16, #tpu.memory_space<vmem>>, vector<1x64x128xbf16>
    %8 = vector.shape_cast %7 : vector<1x64x128xbf16> to vector<64x128xbf16>
    %cst_10 = arith.constant dense<0.000000e+00> : vector<30x128xf32>
    %9 = tpu.matmul %6, %8, %cst_10 {dimension_numbers = #tpu.dot_dimension_numbers<[1], [0], [0], [1], [0, 0, 1, 1], [], []>} : vector<30x64xbf16>, vector<64x128xbf16>, vector<30x128xf32> -> vector<30x128xf32>
    %10 = arith.addf %4, %9 : vector<30x128xf32>
    %c0_11 = arith.constant 0 : index
    %c1_12 = arith.constant 1 : index
    %c0_13 = arith.constant 0 : index
    %11 = vector.load %arg2[%c0_11, %c1_12, %c0_13] : memref<1x31x64xbf16, #tpu.memory_space<vmem>>, vector<1x30x64xbf16>
    %12 = vector.shape_cast %11 : vector<1x30x64xbf16> to vector<30x64xbf16>
    %c2 = arith.constant 2 : index
    %c0_14 = arith.constant 0 : index
    %c0_15 = arith.constant 0 : index
    %13 = vector.load %arg4[%c2, %c0_14, %c0_15] : memref<4x64x128xbf16, #tpu.memory_space<vmem>>, vector<1x64x128xbf16>
    %14 = vector.shape_cast %13 : vector<1x64x128xbf16> to vector<64x128xbf16>
    %cst_16 = arith.constant dense<0.000000e+00> : vector<30x128xf32>
    %15 = tpu.matmul %12, %14, %cst_16 {dimension_numbers = #tpu.dot_dimension_numbers<[1], [0], [0], [1], [0, 0, 1, 1], [], []>} : vector<30x64xbf16>, vector<64x128xbf16>, vector<30x128xf32> -> vector<30x128xf32>
    %16 = arith.addf %10, %15 : vector<30x128xf32>
    %c0_17 = arith.constant 0 : index
    %c1_18 = arith.constant 1 : index
    %c0_19 = arith.constant 0 : index
    %17 = vector.load %arg3[%c0_17, %c1_18, %c0_19] : memref<1x31x64xbf16, #tpu.memory_space<vmem>>, vector<1x30x64xbf16>
    %18 = vector.shape_cast %17 : vector<1x30x64xbf16> to vector<30x64xbf16>
    %c3 = arith.constant 3 : index
    %c0_20 = arith.constant 0 : index
    %c0_21 = arith.constant 0 : index
    %19 = vector.load %arg4[%c3, %c0_20, %c0_21] : memref<4x64x128xbf16, #tpu.memory_space<vmem>>, vector<1x64x128xbf16>
    %20 = vector.shape_cast %19 : vector<1x64x128xbf16> to vector<64x128xbf16>
    %cst_22 = arith.constant dense<0.000000e+00> : vector<30x128xf32>
    %21 = tpu.matmul %18, %20, %cst_22 {dimension_numbers = #tpu.dot_dimension_numbers<[1], [0], [0], [1], [0, 0, 1, 1], [], []>} : vector<30x64xbf16>, vector<64x128xbf16>, vector<30x128xf32> -> vector<30x128xf32>
    %22 = arith.addf %16, %21 : vector<30x128xf32>
    %c0_23 = arith.constant 0 : index
    %c0_24 = arith.constant 0 : index
    %23 = vector.load %arg5[%c0_23, %c0_24] : memref<1x128xf32, #tpu.memory_space<vmem>>, vector<1x128xf32>
    %24 = vector.broadcast %23 : vector<1x128xf32> to vector<30x128xf32>
    %25 = arith.mulf %22, %24 : vector<30x128xf32>
    %c0_25 = arith.constant 0 : index
    %c0_26 = arith.constant 0 : index
    %26 = vector.load %arg6[%c0_25, %c0_26] : memref<1x128xf32, #tpu.memory_space<vmem>>, vector<1x128xf32>
    %27 = vector.broadcast %26 : vector<1x128xf32> to vector<30x128xf32>
    %28 = arith.addf %25, %27 : vector<30x128xf32>
    %cst_27 = arith.constant 0.000000e+00 : f32
    %29 = vector.broadcast %cst_27 : f32 to vector<30x128xf32>
    %30 = arith.maximumf %28, %29 : vector<30x128xf32>
    %31 = arith.truncf %30 : vector<30x128xf32> to vector<30x128xbf16>
    %c0_28 = arith.constant 0 : index
    %c0_29 = arith.constant 0 : index
    %c0_30 = arith.constant 0 : index
    %32 = vector.load %arg7[%c0_28, %c0_29, %c0_30] : memref<1x30x128xbf16, #tpu.memory_space<vmem>>, vector<1x30x128xbf16>
    %33 = vector.shape_cast %32 : vector<1x30x128xbf16> to vector<30x128xbf16>
    %34 = vector.shape_cast %31 : vector<30x128xbf16> to vector<1x30x128xbf16>
    tpu.vector_store %arg7[%c0_28, %c0_29, %c0_30], %34 {strides = array<i32>} : memref<1x30x128xbf16, #tpu.memory_space<vmem>>, vector<1x30x128xbf16>,
    return
  }
  func.func @transform_0(%arg0: i32, %arg1: i32) -> (i32, i32, i32) {
    %c0_i32 = arith.constant 0 : i32
    %c0_i32_0 = arith.constant 0 : i32
    %c0_i32_1 = arith.constant 0 : i32
    return %arg0, %c0_i32, %c0_i32_0 : i32, i32, i32
  }
  func.func @transform_1(%arg0: i32, %arg1: i32) -> (i32, i32, i32) {
    %c0_i32 = arith.constant 0 : i32
    %c0_i32_0 = arith.constant 0 : i32
    %c0_i32_1 = arith.constant 0 : i32
    return %arg0, %c0_i32, %c0_i32_0 : i32, i32, i32
  }
  func.func @transform_2(%arg0: i32, %arg1: i32) -> (i32, i32, i32) {
    %c0_i32 = arith.constant 0 : i32
    %c0_i32_0 = arith.constant 0 : i32
    %c0_i32_1 = arith.constant 0 : i32
    return %c0_i32, %c0_i32_0, %arg1 : i32, i32, i32
  }
  func.func @transform_3(%arg0: i32, %arg1: i32) -> (i32, i32) {
    %c0_i32 = arith.constant 0 : i32
    %c0_i32_0 = arith.constant 0 : i32
    return %c0_i32, %arg1 : i32, i32
  }
  func.func @transform_4(%arg0: i32, %arg1: i32) -> (i32, i32) {
    %c0_i32 = arith.constant 0 : i32
    %c0_i32_0 = arith.constant 0 : i32
    return %c0_i32, %arg1 : i32, i32
  }
  func.func @transform_5(%arg0: i32, %arg1: i32) -> (i32, i32, i32) {
    %c0_i32 = arith.constant 0 : i32
    %c0_i32_0 = arith.constant 0 : i32
    return %arg0, %c0_i32, %arg1 : i32, i32, i32
  }
}

module attributes {stable_mosaic.version = 11 : i64} {
  func.func @conv_bn_relu_kernel(%arg0: i32, %arg1: i32, %arg2: memref<1x15x128xbf16, #tpu.memory_space<vmem>>, %arg3: memref<1x15x128xbf16, #tpu.memory_space<vmem>>, %arg4: memref<4x128x128xbf16, #tpu.memory_space<vmem>>, %arg5: memref<1x128xf32, #tpu.memory_space<vmem>>, %arg6: memref<1x128xf32, #tpu.memory_space<vmem>>, %arg7: memref<1x14x128xbf16, #tpu.memory_space<vmem>>) attributes {dimension_semantics = [#tpu.dimension_semantics<parallel>, #tpu.dimension_semantics<parallel>], iteration_bounds = array<i64: 2, 2>, scalar_prefetch = 0 : i64, scratch_operands = 0 : i64, tpu.core_type = #tpu.core_type<tc>, window_params = [{transform_indices = @transform_0, window_bounds = array<i64: 1, 15, 128>}, {transform_indices = @transform_1, window_bounds = array<i64: 1, 15, 128>}, {transform_indices = @transform_2, window_bounds = array<i64: 4, 128, 128>}, {transform_indices = @transform_3, window_bounds = array<i64: 1, 128>}, {transform_indices = @transform_4, window_bounds = array<i64: 1, 128>}, {transform_indices = @transform_5, window_bounds = array<i64: 1, 14, 128>}]} {
    %c0 = arith.constant 0 : index
    %c0_0 = arith.constant 0 : index
    %c0_1 = arith.constant 0 : index
    %0 = vector.load %arg2[%c0, %c0_0, %c0_1] : memref<1x15x128xbf16, #tpu.memory_space<vmem>>, vector<1x14x128xbf16>
    %1 = vector.shape_cast %0 : vector<1x14x128xbf16> to vector<14x128xbf16>
    %c0_2 = arith.constant 0 : index
    %c0_3 = arith.constant 0 : index
    %c0_4 = arith.constant 0 : index
    %2 = vector.load %arg4[%c0_2, %c0_3, %c0_4] : memref<4x128x128xbf16, #tpu.memory_space<vmem>>, vector<1x128x128xbf16>
    %3 = vector.shape_cast %2 : vector<1x128x128xbf16> to vector<128x128xbf16>
    %cst = arith.constant dense<0.000000e+00> : vector<14x128xf32>
    %4 = tpu.matmul %1, %3, %cst {dimension_numbers = #tpu.dot_dimension_numbers<[1], [0], [0], [1], [0, 0, 1, 1], [], []>} : vector<14x128xbf16>, vector<128x128xbf16>, vector<14x128xf32> -> vector<14x128xf32>
    %c0_5 = arith.constant 0 : index
    %c0_6 = arith.constant 0 : index
    %c0_7 = arith.constant 0 : index
    %5 = vector.load %arg3[%c0_5, %c0_6, %c0_7] : memref<1x15x128xbf16, #tpu.memory_space<vmem>>, vector<1x14x128xbf16>
    %6 = vector.shape_cast %5 : vector<1x14x128xbf16> to vector<14x128xbf16>
    %c1 = arith.constant 1 : index
    %c0_8 = arith.constant 0 : index
    %c0_9 = arith.constant 0 : index
    %7 = vector.load %arg4[%c1, %c0_8, %c0_9] : memref<4x128x128xbf16, #tpu.memory_space<vmem>>, vector<1x128x128xbf16>
    %8 = vector.shape_cast %7 : vector<1x128x128xbf16> to vector<128x128xbf16>
    %cst_10 = arith.constant dense<0.000000e+00> : vector<14x128xf32>
    %9 = tpu.matmul %6, %8, %cst_10 {dimension_numbers = #tpu.dot_dimension_numbers<[1], [0], [0], [1], [0, 0, 1, 1], [], []>} : vector<14x128xbf16>, vector<128x128xbf16>, vector<14x128xf32> -> vector<14x128xf32>
    %10 = arith.addf %4, %9 : vector<14x128xf32>
    %c0_11 = arith.constant 0 : index
    %c1_12 = arith.constant 1 : index
    %c0_13 = arith.constant 0 : index
    %11 = vector.load %arg2[%c0_11, %c1_12, %c0_13] : memref<1x15x128xbf16, #tpu.memory_space<vmem>>, vector<1x14x128xbf16>
    %12 = vector.shape_cast %11 : vector<1x14x128xbf16> to vector<14x128xbf16>
    %c2 = arith.constant 2 : index
    %c0_14 = arith.constant 0 : index
    %c0_15 = arith.constant 0 : index
    %13 = vector.load %arg4[%c2, %c0_14, %c0_15] : memref<4x128x128xbf16, #tpu.memory_space<vmem>>, vector<1x128x128xbf16>
    %14 = vector.shape_cast %13 : vector<1x128x128xbf16> to vector<128x128xbf16>
    %cst_16 = arith.constant dense<0.000000e+00> : vector<14x128xf32>
    %15 = tpu.matmul %12, %14, %cst_16 {dimension_numbers = #tpu.dot_dimension_numbers<[1], [0], [0], [1], [0, 0, 1, 1], [], []>} : vector<14x128xbf16>, vector<128x128xbf16>, vector<14x128xf32> -> vector<14x128xf32>
    %16 = arith.addf %10, %15 : vector<14x128xf32>
    %c0_17 = arith.constant 0 : index
    %c1_18 = arith.constant 1 : index
    %c0_19 = arith.constant 0 : index
    %17 = vector.load %arg3[%c0_17, %c1_18, %c0_19] : memref<1x15x128xbf16, #tpu.memory_space<vmem>>, vector<1x14x128xbf16>
    %18 = vector.shape_cast %17 : vector<1x14x128xbf16> to vector<14x128xbf16>
    %c3 = arith.constant 3 : index
    %c0_20 = arith.constant 0 : index
    %c0_21 = arith.constant 0 : index
    %19 = vector.load %arg4[%c3, %c0_20, %c0_21] : memref<4x128x128xbf16, #tpu.memory_space<vmem>>, vector<1x128x128xbf16>
    %20 = vector.shape_cast %19 : vector<1x128x128xbf16> to vector<128x128xbf16>
    %cst_22 = arith.constant dense<0.000000e+00> : vector<14x128xf32>
    %21 = tpu.matmul %18, %20, %cst_22 {dimension_numbers = #tpu.dot_dimension_numbers<[1], [0], [0], [1], [0, 0, 1, 1], [], []>} : vector<14x128xbf16>, vector<128x128xbf16>, vector<14x128xf32> -> vector<14x128xf32>
    %22 = arith.addf %16, %21 : vector<14x128xf32>
    %c0_23 = arith.constant 0 : index
    %c0_24 = arith.constant 0 : index
    %23 = vector.load %arg5[%c0_23, %c0_24] : memref<1x128xf32, #tpu.memory_space<vmem>>, vector<1x128xf32>
    %24 = vector.broadcast %23 : vector<1x128xf32> to vector<14x128xf32>
    %25 = arith.mulf %22, %24 : vector<14x128xf32>
    %c0_25 = arith.constant 0 : index
    %c0_26 = arith.constant 0 : index
    %26 = vector.load %arg6[%c0_25, %c0_26] : memref<1x128xf32, #tpu.memory_space<vmem>>, vector<1x128xf32>
    %27 = vector.broadcast %26 : vector<1x128xf32> to vector<14x128xf32>
    %28 = arith.addf %25, %27 : vector<14x128xf32>
    %cst_27 = arith.constant 0.000000e+00 : f32
    %29 = vector.broadcast %cst_27 : f32 to vector<14x128xf32>
    %30 = arith.maximumf %28, %29 : vector<14x128xf32>
    %31 = arith.truncf %30 : vector<14x128xf32> to vector<14x128xbf16>
    %c0_28 = arith.constant 0 : index
    %c0_29 = arith.constant 0 : index
    %c0_30 = arith.constant 0 : index
    %32 = vector.load %arg7[%c0_28, %c0_29, %c0_30] : memref<1x14x128xbf16, #tpu.memory_space<vmem>>, vector<1x14x128xbf16>
    %33 = vector.shape_cast %32 : vector<1x14x128xbf16> to vector<14x128xbf16>
    %34 = vector.shape_cast %31 : vector<14x128xbf16> to vector<1x14x128xbf16>
    tpu.vector_store %arg7[%c0_28, %c0_29, %c0_30], %34 {strides = array<i32>} : memref<1x14x128xbf16, #tpu.memory_space<vmem>>, vector<1x14x128xbf16>,
    return
  }
  func.func @transform_0(%arg0: i32, %arg1: i32) -> (i32, i32, i32) {
    %c0_i32 = arith.constant 0 : i32
    %c0_i32_0 = arith.constant 0 : i32
    %c0_i32_1 = arith.constant 0 : i32
    return %arg0, %c0_i32, %c0_i32_0 : i32, i32, i32
  }
  func.func @transform_1(%arg0: i32, %arg1: i32) -> (i32, i32, i32) {
    %c0_i32 = arith.constant 0 : i32
    %c0_i32_0 = arith.constant 0 : i32
    %c0_i32_1 = arith.constant 0 : i32
    return %arg0, %c0_i32, %c0_i32_0 : i32, i32, i32
  }
  func.func @transform_2(%arg0: i32, %arg1: i32) -> (i32, i32, i32) {
    %c0_i32 = arith.constant 0 : i32
    %c0_i32_0 = arith.constant 0 : i32
    %c0_i32_1 = arith.constant 0 : i32
    return %c0_i32, %c0_i32_0, %arg1 : i32, i32, i32
  }
  func.func @transform_3(%arg0: i32, %arg1: i32) -> (i32, i32) {
    %c0_i32 = arith.constant 0 : i32
    %c0_i32_0 = arith.constant 0 : i32
    return %c0_i32, %arg1 : i32, i32
  }
  func.func @transform_4(%arg0: i32, %arg1: i32) -> (i32, i32) {
    %c0_i32 = arith.constant 0 : i32
    %c0_i32_0 = arith.constant 0 : i32
    return %c0_i32, %arg1 : i32, i32
  }
  func.func @transform_5(%arg0: i32, %arg1: i32) -> (i32, i32, i32) {
    %c0_i32 = arith.constant 0 : i32
    %c0_i32_0 = arith.constant 0 : i32
    return %arg0, %c0_i32, %arg1 : i32, i32, i32
  }
}

module attributes {stable_mosaic.version = 11 : i64} {
  func.func @maxpool_s2_kernel(%arg0: i32, %arg1: memref<1x7x256xbf16, #tpu.memory_space<vmem>>, %arg2: memref<1x7x256xbf16, #tpu.memory_space<vmem>>, %arg3: memref<1x4x256xbf16, #tpu.memory_space<vmem>>) attributes {dimension_semantics = [#tpu.dimension_semantics<parallel>], iteration_bounds = array<i64: 2>, scalar_prefetch = 0 : i64, scratch_operands = 0 : i64, tpu.core_type = #tpu.core_type<tc>, window_params = [{transform_indices = @transform_0, window_bounds = array<i64: 1, 7, 256>}, {transform_indices = @transform_1, window_bounds = array<i64: 1, 7, 256>}, {transform_indices = @transform_2, window_bounds = array<i64: 1, 4, 256>}]} {
    %c0 = arith.constant 0 : index
    %c0_0 = arith.constant 0 : index
    %c0_1 = arith.constant 0 : index
    %0 = vector.load %arg1[%c0, %c0_0, %c0_1] : memref<1x7x256xbf16, #tpu.memory_space<vmem>>, vector<1x4x256xbf16>
    %1 = vector.shape_cast %0 : vector<1x4x256xbf16> to vector<4x256xbf16>
    %c0_2 = arith.constant 0 : index
    %c0_3 = arith.constant 0 : index
    %c0_4 = arith.constant 0 : index
    %2 = vector.load %arg2[%c0_2, %c0_3, %c0_4] : memref<1x7x256xbf16, #tpu.memory_space<vmem>>, vector<1x4x256xbf16>
    %3 = vector.shape_cast %2 : vector<1x4x256xbf16> to vector<4x256xbf16>
    %4 = arith.maximumf %1, %3 : vector<4x256xbf16>
    %c0_5 = arith.constant 0 : index
    %c1 = arith.constant 1 : index
    %c0_6 = arith.constant 0 : index
    %5 = vector.load %arg1[%c0_5, %c1, %c0_6] : memref<1x7x256xbf16, #tpu.memory_space<vmem>>, vector<1x4x256xbf16>
    %6 = vector.shape_cast %5 : vector<1x4x256xbf16> to vector<4x256xbf16>
    %c0_7 = arith.constant 0 : index
    %c1_8 = arith.constant 1 : index
    %c0_9 = arith.constant 0 : index
    %7 = vector.load %arg2[%c0_7, %c1_8, %c0_9] : memref<1x7x256xbf16, #tpu.memory_space<vmem>>, vector<1x4x256xbf16>
    %8 = vector.shape_cast %7 : vector<1x4x256xbf16> to vector<4x256xbf16>
    %9 = arith.maximumf %6, %8 : vector<4x256xbf16>
    %10 = arith.maximumf %4, %9 : vector<4x256xbf16>
    %c0_10 = arith.constant 0 : index
    %c2 = arith.constant 2 : index
    %c0_11 = arith.constant 0 : index
    %11 = vector.load %arg1[%c0_10, %c2, %c0_11] : memref<1x7x256xbf16, #tpu.memory_space<vmem>>, vector<1x4x256xbf16>
    %12 = vector.shape_cast %11 : vector<1x4x256xbf16> to vector<4x256xbf16>
    %c0_12 = arith.constant 0 : index
    %c2_13 = arith.constant 2 : index
    %c0_14 = arith.constant 0 : index
    %13 = vector.load %arg2[%c0_12, %c2_13, %c0_14] : memref<1x7x256xbf16, #tpu.memory_space<vmem>>, vector<1x4x256xbf16>
    %14 = vector.shape_cast %13 : vector<1x4x256xbf16> to vector<4x256xbf16>
    %15 = arith.maximumf %12, %14 : vector<4x256xbf16>
    %16 = arith.maximumf %10, %15 : vector<4x256xbf16>
    %c0_15 = arith.constant 0 : index
    %c3 = arith.constant 3 : index
    %c0_16 = arith.constant 0 : index
    %17 = vector.load %arg1[%c0_15, %c3, %c0_16] : memref<1x7x256xbf16, #tpu.memory_space<vmem>>, vector<1x4x256xbf16>
    %18 = vector.shape_cast %17 : vector<1x4x256xbf16> to vector<4x256xbf16>
    %c0_17 = arith.constant 0 : index
    %c3_18 = arith.constant 3 : index
    %c0_19 = arith.constant 0 : index
    %19 = vector.load %arg2[%c0_17, %c3_18, %c0_19] : memref<1x7x256xbf16, #tpu.memory_space<vmem>>, vector<1x4x256xbf16>
    %20 = vector.shape_cast %19 : vector<1x4x256xbf16> to vector<4x256xbf16>
    %21 = arith.maximumf %18, %20 : vector<4x256xbf16>
    %22 = arith.maximumf %16, %21 : vector<4x256xbf16>
    %c0_20 = arith.constant 0 : index
    %c0_21 = arith.constant 0 : index
    %c0_22 = arith.constant 0 : index
    %23 = vector.load %arg3[%c0_20, %c0_21, %c0_22] : memref<1x4x256xbf16, #tpu.memory_space<vmem>>, vector<1x4x256xbf16>
    %24 = vector.shape_cast %23 : vector<1x4x256xbf16> to vector<4x256xbf16>
    %25 = vector.shape_cast %22 : vector<4x256xbf16> to vector<1x4x256xbf16>
    tpu.vector_store %arg3[%c0_20, %c0_21, %c0_22], %25 {strides = array<i32>} : memref<1x4x256xbf16, #tpu.memory_space<vmem>>, vector<1x4x256xbf16>,
    return
  }
  func.func @transform_0(%arg0: i32) -> (i32, i32, i32) {
    %c0_i32 = arith.constant 0 : i32
    %c0_i32_0 = arith.constant 0 : i32
    %c0_i32_1 = arith.constant 0 : i32
    return %arg0, %c0_i32, %c0_i32_0 : i32, i32, i32
  }
  func.func @transform_1(%arg0: i32) -> (i32, i32, i32) {
    %c0_i32 = arith.constant 0 : i32
    %c0_i32_0 = arith.constant 0 : i32
    %c0_i32_1 = arith.constant 0 : i32
    return %arg0, %c0_i32, %c0_i32_0 : i32, i32, i32
  }
  func.func @transform_2(%arg0: i32) -> (i32, i32, i32) {
    %c0_i32 = arith.constant 0 : i32
    %c0_i32_0 = arith.constant 0 : i32
    %c0_i32_1 = arith.constant 0 : i32
    return %arg0, %c0_i32, %c0_i32_0 : i32, i32, i32
  }
}

module attributes {stable_mosaic.version = 11 : i64} {
  func.func @linear_sigmoid_kernel(%arg0: i32, %arg1: memref<2x1024xbf16, #tpu.memory_space<vmem>>, %arg2: memref<1x1024xf32, #tpu.memory_space<vmem>>, %arg3: memref<1x1xf32, #tpu.memory_space<vmem>>, %arg4: memref<2x1xf32, #tpu.memory_space<vmem>>) attributes {dimension_semantics = [#tpu.dimension_semantics<arbitrary>], iteration_bounds = array<i64: 1>, scalar_prefetch = 0 : i64, scratch_operands = 0 : i64, tpu.core_type = #tpu.core_type<tc>, window_params = [{pipeline_mode = #tpu.pipeline_mode<synchronous>, transform_indices = @transform_0, window_bounds = array<i64: 2, 1024>}, {pipeline_mode = #tpu.pipeline_mode<synchronous>, transform_indices = @transform_1, window_bounds = array<i64: 1, 1024>}, {pipeline_mode = #tpu.pipeline_mode<synchronous>, transform_indices = @transform_2, window_bounds = array<i64: 1, 1>}, {pipeline_mode = #tpu.pipeline_mode<synchronous>, transform_indices = @transform_3, window_bounds = array<i64: 2, 1>}]} {
    %c0 = arith.constant 0 : index
    %c0_0 = arith.constant 0 : index
    %0 = vector.load %arg1[%c0, %c0_0] : memref<2x1024xbf16, #tpu.memory_space<vmem>>, vector<2x1024xbf16>
    %1 = arith.extf %0 : vector<2x1024xbf16> to vector<2x1024xf32>
    %c0_1 = arith.constant 0 : index
    %c0_2 = arith.constant 0 : index
    %2 = vector.load %arg2[%c0_1, %c0_2] : memref<1x1024xf32, #tpu.memory_space<vmem>>, vector<1x1024xf32>
    %3 = vector.broadcast %2 : vector<1x1024xf32> to vector<2x1024xf32>
    %4 = arith.mulf %1, %3 : vector<2x1024xf32>
    %cst = arith.constant dense<0.000000e+00> : vector<2xf32>
    %5 = vector.multi_reduction <add>, %4, %cst [1] : vector<2x1024xf32> to vector<2xf32>
    %6 = vector.shape_cast %5 : vector<2xf32> to vector<2x1xf32>
    %c0_3 = arith.constant 0 : index
    %c0_4 = arith.constant 0 : index
    %7 = vector.load %arg3[%c0_3, %c0_4] : memref<1x1xf32, #tpu.memory_space<vmem>>, vector<1x1xf32>
    %8 = vector.broadcast %7 : vector<1x1xf32> to vector<2x1xf32>
    %9 = arith.addf %6, %8 : vector<2x1xf32>
    %10 = arith.negf %9 : vector<2x1xf32>
    %11 = math.exp %10 : vector<2x1xf32>
    %cst_5 = arith.constant 1.000000e+00 : f32
    %12 = vector.broadcast %cst_5 : f32 to vector<2x1xf32>
    %13 = arith.addf %12, %11 : vector<2x1xf32>
    %14 = arith.divf %12, %13 : vector<2x1xf32>
    %c0_6 = arith.constant 0 : index
    %c0_7 = arith.constant 0 : index
    %15 = vector.load %arg4[%c0_6, %c0_7] : memref<2x1xf32, #tpu.memory_space<vmem>>, vector<2x1xf32>
    tpu.vector_store %arg4[%c0_6, %c0_7], %14 {strides = array<i32>} : memref<2x1xf32, #tpu.memory_space<vmem>>, vector<2x1xf32>,
    return
  }
  func.func @transform_0(%arg0: i32) -> (i32, i32) {
    %c0_i32 = arith.constant 0 : i32
    %c0_i32_0 = arith.constant 0 : i32
    %c0_i32_1 = arith.constant 0 : i32
    return %c0_i32, %c0_i32_0 : i32, i32
  }
  func.func @transform_1(%arg0: i32) -> (i32, i32) {
    %c0_i32 = arith.constant 0 : i32
    %c0_i32_0 = arith.constant 0 : i32
    %c0_i32_1 = arith.constant 0 : i32
    return %c0_i32, %c0_i32_0 : i32, i32
  }
  func.func @transform_2(%arg0: i32) -> (i32, i32) {
    %c0_i32 = arith.constant 0 : i32
    %c0_i32_0 = arith.constant 0 : i32
    %c0_i32_1 = arith.constant 0 : i32
    return %c0_i32, %c0_i32_0 : i32, i32
  }
  func.func @transform_3(%arg0: i32) -> (i32, i32) {
    %c0_i32 = arith.constant 0 : i32
    %c0_i32_0 = arith.constant 0 : i32
    %c0_i32_1 = arith.constant 0 : i32
    return %c0_i32, %c0_i32_0 : i32, i32
  }
}

</mosaic_0001>

<bundles_post_ra>
// kernel: cnn_forward.5
= control target key start
LH: loop header
LB: loop body
LE: loop exit
PB: predicated region body
PF: predicated region fallthrough
CT: control target
= control target key end

     0   :  { %s975_s18 = smov 0   ;;  %s977_s19 = smov 0   ;;  %s1163_s0 = inlined_call_operand.vmem [shape: bf16[2,64,1], index: 0, kind: input, shape index: {}]   ;;  %s1164_s1 = inlined_call_operand.vmem [shape: bf16[2,64,1], index: 1, kind: input, shape index: {}]   ;;  %s1165_s2 = inlined_call_operand.vmem [shape: bf16[4,1,64], index: 2, kind: input, shape index: {}]   ;;  %s1166_s3 = inlined_call_operand.vmem [shape: f32[1,64], index: 3, kind: input, shape index: {}]   ;;  %s1167_s4 = inlined_call_operand.vmem [shape: f32[1,64], index: 4, kind: input, shape index: {}]   ;;  %s1168_s5 = inlined_call_operand.vmem [shape: bf16[2,63,64], index: 5, kind: output, shape index: {}]  }
   0x1   :  { %s979_s20 = smov 0  }
   0x2 LB: > { %s27_s21 = sadd.s32 1, %s938_s19  ;;  %p782_p0 = scmp.ge.s32.totalorder %s942_s20, 1  ;;  %s942_s20 = sphi %s979_s20, %s15_s20   ;;  %s938_s19 = sphi %s977_s19, %s1172_s19   ;;  %s934_s18 = sphi %s975_s18, %s1171_s18  }
   0x3   : > { %p29_p1 = scmp.ge.s32.totalorder %s27_s21, 2  ;;  %p235_p2 = scmp.lt.s32.totalorder %s942_s20, 3 }
   0x5   : > { %s1174_s21 = smov (%p29_p1, %s27_s21), 0  ;;  %p236_p3 = pnand %p782_p0, %p235_p2 }
   0x6   : > { %p280_p4 = scmp.lt.s32.totalorder (!%p236_p3), %s934_s18, 1  ;;  %v944_v0 = vmov (!%p236_p3), 0   ;;  %v365_v33 = vlaneseq (!%p236_p3)  ;;  %v790_v35 = vld [vmem:[%s1165_s2 + $0x2] sm:$0x1] (!%p236_p3)  ;;  %v315_v36 = vld [vmem:[%s1165_s2] sm:$0x1] (!%p236_p3) }
   0x7   : > { %239 = sbr.rel (%p236_p3) target bundleno = 193 (0xc1), region = 40  ;;  %889 = vset.pattern.permute.xlu1 (!%p236_p3), %v944_v0  ;;  %878 = vset.pattern.permute.xlu0 (!%p236_p3), %v944_v0  ;;  %v458_v38 = vunpack.c.l.bf16 (!%p236_p3), %v790_v35  ;;  %v324_v39 = vunpack.c.l.bf16 (!%p236_p3), %v315_v36  ;;  %v789_v40 = vld [vmem:[%s1165_s2 + $0x1] sm:$0x1] (!%p236_p3)  ;;  %v791_v41 = vld [vmem:[%s1165_s2 + $0x3] sm:$0x1] (!%p236_p3)  ;;  %vm479_vm0 = vcmask (!%p236_p3), 1046528  }
   0x8   : > { %v366_v34 = vshrl.u32 (!%p236_p3), %v365_v33, 7  ;;  %v395_v43 = vunpack.c.l.bf16 (!%p236_p3), %v789_v40  ;;  %v513_v44 = vunpack.c.l.bf16 (!%p236_p3), %v791_v41  ;;  %vm635_vm1 = vcmask (!%p236_p3), 519168  }
   0x9   : > { %vm644_vm2 = vsmask.f32 (!%p236_p3), 3328 }
   0xa   : > { %v367_v37 = vsub.s32 (!%p236_p3), 0, %v366_v34  ;;  %vm1105_vm3 = vmand (!%p236_p3), %vm635_vm1, %vm644_vm2 }
   0xc   : > { %v462_v42 = vrot.slane (!%p236_p3), %v458_v38, %v367_v37  ;;  %v368_v45 = vrot.slane (!%p236_p3), %v324_v39, %v367_v37  ;;  %v1019_v54 = vrot.slane (!%p236_p3), %v395_v43, %v367_v37  ;;  %v1021_v55 = vrot.slane (!%p236_p3), %v513_v44, %v367_v37 }
   0xe   : > { %s1176_s18 = smov (!%p280_p4, %s934_s18), 1 }
   0xf   : > { %s993_s22 = sshll.u32 %s1176_s18, 5 }
  0x10   : > { %s284_s25 = scalar_lea.vmem %s1163_s0, %s993_s22  ;;  %s289_s28 = scalar_lea.vmem %s1164_s1, %s993_s22 }
  0x11   : > { %v848_v1 = vld [vmem:[%s284_s25 + $0x10] sm:$0xff]   ;;  %v816_v2 = vld [vmem:[%s284_s25] sm:$0xff]   ;;  %v849_v3 = vld [vmem:[%s284_s25 + $0x18] sm:$0xff]   ;;  %s1094_s18 = scalar_lea.vmem %s1168_s5, %s993_s22 }
  0x12   : > { %v825_v4 = vunpack.c.l.bf16 %v848_v1  ;;  %v826_v5 = vunpack.c.h.bf16 %v848_v1  ;;  %v817_v6 = vunpack.c.l.bf16 %v816_v2  ;;  %v818_v7 = vunpack.c.h.bf16 %v816_v2  ;;  %v847_v8 = vld [vmem:[%s284_s25 + $0x8] sm:$0xff]   ;;  %v832_v9 = vld [vmem:[%s289_s28] sm:$0xff]   ;;  %v852_v15 = vld [vmem:[%s289_s28 + $0x18] sm:$0xff]  }
  0x13   : > { %v850_v10 = vld [vmem:[%s289_s28 + $0x8] sm:$0xff]   ;;  %v829_v11 = vunpack.c.l.bf16 %v849_v3  ;;  %v830_v12 = vunpack.c.h.bf16 %v849_v3  ;;  %v821_v13 = vunpack.c.l.bf16 %v847_v8  ;;  %v822_v14 = vunpack.c.h.bf16 %v847_v8  ;;  %v851_v24 = vld [vmem:[%s289_s28 + $0x10] sm:$0xff]  }
  0x14   : > { %v890_v16 = vpack.i.bf16 %v826_v5, %v825_v4  ;;  %v879_v17 = vpack.i.bf16 %v818_v7, %v817_v6  ;;  %v834_v18 = vunpack.c.h.bf16 %v832_v9  ;;  %v837_v19 = vunpack.c.l.bf16 %v850_v10 }
  0x15   : > { %v895_v20 = vpack.i.bf16 %v830_v12, %v829_v11  ;;  %v884_v21 = vpack.i.bf16 %v822_v14, %v821_v13  ;;  %v833_v22 = vunpack.c.l.bf16 %v832_v9  ;;  %v846_v23 = vunpack.c.h.bf16 %v852_v15 }
  0x16   : > { %891 = vperm.xlu1 %889, %v890_v16   ;;  %880 = vperm.xlu0 %878, %v879_v17   ;;  %v905_v25 = vpack.i.bf16 %v837_v19, %v834_v18  ;;  %v842_v26 = vunpack.c.h.bf16 %v851_v24  ;;  %v845_v28 = vunpack.c.l.bf16 %v852_v15  ;;  %v838_v29 = vunpack.c.h.bf16 %v850_v10 }
  0x17   : > { %v900_v27 = vpack.i.bf16 %v833_v22, %v846_v23  ;;  %v841_v30 = vunpack.c.l.bf16 %v851_v24 }
  0x18   : > { %v915_v31 = vpack.i.bf16 %v845_v28, %v842_v26 }
  0x19   : > { %v910_v32 = vpack.i.bf16 %v841_v30, %v838_v29 }
  0x1a   : > { %896 = vperm.xlu1 %889, %v895_v20   ;;  %885 = vperm.xlu0 %878, %v884_v21  }
  0x1e   : > { %906 = vperm.xlu1 %889, %v905_v25   ;;  %901 = vperm.xlu0 %878, %v900_v27  }
  0x22   : > { %916 = vperm.xlu1 %889, %v915_v31   ;;  %911 = vperm.xlu0 %878, %v910_v32  }
  0x95   : > { %v892_v46 = vpop.permute.xlu1 %891  ;;  %v881_v47 = vpop.permute.xlu0 %880 }
  0x96   : > { %v894_v48 = vunpack.i.h.bf16 %v892_v46  ;;  %v893_v49 = vunpack.i.l.bf16 %v892_v46  ;;  %v883_v50 = vunpack.i.h.bf16 %v881_v47  ;;  %v882_v51 = vunpack.i.l.bf16 %v881_v47 }
  0x98   : > { %v1015_v52 = vmul.f32 %v894_v48, %v462_v42  ;;  %v1017_v53 = vmul.f32 %v893_v49, %v462_v42  ;;  %v1023_v56 = vmul.f32 %v894_v48, %v368_v45  ;;  %v1025_v57 = vmul.f32 %v893_v49, %v368_v45 }
  0x99   : > { %v464_v58 = vmul.f32 %v883_v50, %v462_v42  ;;  %v463_v59 = vmul.f32 %v882_v51, %v462_v42  ;;  %v897_v60 = vpop.permute.xlu1 %896  ;;  %v886_v61 = vpop.permute.xlu0 %885  ;;  %v370_v62 = vmul.f32 %v883_v50, %v368_v45  ;;  %v369_v63 = vmul.f32 %v882_v51, %v368_v45 }
  0x9a   : > { %v899_v0 = vunpack.i.h.bf16 %v897_v60  ;;  %v898_v1 = vunpack.i.l.bf16 %v897_v60  ;;  %v489_v2 = vrot.slane %v1015_v52, 1  ;;  %v487_v3 = vrot.slane %v1017_v53, 1  ;;  %v1072_v60 = vld [vmem:[%s1167_s4] ss:$0 sm:$0xff] }
  0x9b   : > { %v888_v4 = vunpack.i.h.bf16 %v886_v61  ;;  %v887_v5 = vunpack.i.l.bf16 %v886_v61  ;;  %v481_v6 = vrot.slane %v464_v58, 1  ;;  %v480_v7 = vrot.slane %v463_v59, 1 }
  0x9c   : > { %v376_v8 = vmul.f32 %v899_v0, %v368_v45  ;;  %v1029_v9 = vmul.f32 %v899_v0, %v462_v42  ;;  %v375_v10 = vmul.f32 %v898_v1, %v368_v45  ;;  %v1031_v11 = vmul.f32 %v898_v1, %v462_v42 }
  0x9d   : > { %v1033_v12 = vmul.f32 %v888_v4, %v462_v42  ;;  %v465_v13 = vmul.f32 %v887_v5, %v462_v42  ;;  %v907_v14 = vpop.permute.xlu1 %906  ;;  %v902_v15 = vpop.permute.xlu0 %901  ;;  %v1035_v16 = vmul.f32 %v888_v4, %v368_v45  ;;  %v371_v17 = vmul.f32 %v887_v5, %v368_v45  ;;  %v1064_v45 = vld [vmem:[%s1166_s3] ss:$0 sm:$0xff] }
  0x9e   : > { %v909_v18 = vunpack.i.h.bf16 %v907_v14  ;;  %v908_v19 = vunpack.i.l.bf16 %v907_v14  ;;  %v904_v22 = vunpack.i.h.bf16 %v902_v15  ;;  %v903_v23 = vunpack.i.l.bf16 %v902_v15 }
  0x9f   : > { %v485_v20 = vrot.slane %v1033_v12, 1  ;;  %v483_v21 = vrot.slane %v465_v13, 1  ;;  %v493_v24 = vrot.slane %v1029_v9, 1  ;;  %v491_v28 = vrot.slane %v1031_v11, 1 }
  0xa0   : > { %v1040_v25 = vmul.f32 %v909_v18, %v1021_v55  ;;  %v441_v26 = vmul.f32 %v908_v19, %v1019_v54  ;;  %v519_v27 = vmul.f32 %v908_v19, %v1021_v55  ;;  %v442_v29 = vmul.f32 %v909_v18, %v1019_v54 }
  0xa1   : > { %v440_v30 = vmul.f32 %v904_v22, %v1019_v54  ;;  %v518_v31 = vmul.f32 %v904_v22, %v1021_v55  ;;  %v484_v34 = vsel %vm479_vm0, %v481_v6, %v483_v21  ;;  %v917_v36 = vpop.permute.xlu1 %916  ;;  %v1053_v37 = vsel %vm479_vm0, %v483_v21, %v485_v20  ;;  %v912_v13 = vpop.permute.xlu0 %911 }
  0xa2   : > { %v537_v32 = vrot.slane %v1040_v25, 1  ;;  %v449_v33 = vadd.f32 %v441_v26, %v370_v62  ;;  %v535_v35 = vrot.slane %v519_v27, 1  ;;  %v447_v39 = vmul.f32 %v903_v23, %v1019_v54 }
  0xa3   : > { %v534_v38 = vrot.slane %v518_v31, 1  ;;  %v448_v40 = vadd.f32 %v440_v30, %v369_v63  ;;  %v482_v43 = vsel %vm479_vm0, %v480_v7, %v481_v6  ;;  %v525_v44 = vmul.f32 %v903_v23, %v1021_v55 }
  0xa4   : > { %v504_v41 = vadd.f32 %v484_v34, %v449_v33  ;;  %v538_v42 = vsel %vm479_vm0, %v535_v35, %v537_v32  ;;  %v455_v47 = vadd.f32 %v447_v39, %v376_v8  ;;  %v919_v49 = vunpack.i.h.bf16 %v917_v36 }
  0xa5   : > { %v536_v46 = vsel %vm479_vm0, %v534_v38, %v535_v35  ;;  %v503_v48 = vadd.f32 %v482_v43, %v448_v40  ;;  %v1067_v50 = vadd.f32 %v442_v29, %v371_v17  ;;  %v547_v58 = vrot.slane %v525_v44, 1 }
  0xa6   : > { %v558_v51 = vadd.f32 %v538_v42, %v504_v41  ;;  %v918_v59 = vunpack.i.l.bf16 %v917_v36  ;;  %v510_v61 = vadd.f32 %v493_v24, %v455_v47  ;;  %v446_v63 = vmul.f32 %v919_v49, %v1019_v54  ;;  %v646_v42 = vld [vmem:[%s1094_s18 + $0x1c] sm:$0xf] }
  0xa7   : > { %v557_v62 = vadd.f32 %v536_v46, %v503_v48  ;;  %v524_v0 = vmul.f32 %v919_v49, %v1021_v55  ;;  %v492_v5 = vsel %vm479_vm0, %v489_v2, %v491_v28  ;;  %v494_v17 = vsel %vm479_vm0, %v491_v28, %v493_v24 }
  0xa8   : > { %v573_v1 = vmul.f32 %v1064_v45, %v558_v51  ;;  %v445_v4 = vmul.f32 %v918_v59, %v1019_v54  ;;  %v523_v6 = vmul.f32 %v918_v59, %v1021_v55  ;;  %v564_v7 = vadd.f32 %v547_v58, %v510_v61 }
  0xa9   : > { %v572_v8 = vmul.f32 %v1064_v45, %v557_v62  ;;  %v545_v9 = vrot.slane %v524_v0, 1  ;;  %v454_v11 = vadd.f32 %v446_v63, %v375_v10  ;;  %v914_v10 = vunpack.i.h.bf16 %v912_v13 }
  0xaa   : > { %v588_v14 = vadd.f32 %v1072_v60, %v573_v1  ;;  %v453_v15 = vadd.f32 %v445_v4, %v1023_v56  ;;  %v543_v18 = vrot.slane %v523_v6, 1  ;;  %v579_v19 = vmul.f32 %v1064_v45, %v564_v7 }
  0xab   : > { %v587_v21 = vadd.f32 %v1072_v60, %v572_v8  ;;  %v509_v22 = vadd.f32 %v494_v17, %v454_v11  ;;  %v548_v23 = vsel %vm479_vm0, %v545_v9, %v547_v58  ;;  %v913_v30 = vunpack.i.l.bf16 %v912_v13 }
  0xac   : > { %v596_v26 = vmax.f32 %v588_v14, 0.0  ;;  %v508_v27 = vadd.f32 %v492_v5, %v453_v15  ;;  %v546_v29 = vsel %vm479_vm0, %v543_v18, %v545_v9  ;;  %v594_v56 = vadd.f32 %v1072_v60, %v579_v19 }
  0xad   : > { %v595_v24 = vmax.f32 %v587_v21, 0.0  ;;  %v563_v28 = vadd.f32 %v548_v23, %v509_v22  ;;  %v444_v34 = vmul.f32 %v914_v10, %v1019_v54  ;;  %v522_v35 = vmul.f32 %v914_v10, %v1021_v55 }
  0xae   : > { %v808_v31 = vpack.c.bf16 %v596_v26, %v596_v26  ;;  %v562_v33 = vadd.f32 %v546_v29, %v508_v27  ;;  %v602_v36 = vmax.f32 %v594_v56, 0.0  ;;  %v443_v40 = vmul.f32 %v913_v30, %v1019_v54 }
  0xaf   : > { %v807_v38 = vpack.c.bf16 %v595_v24, %v595_v24  ;;  %v578_v39 = vmul.f32 %v1064_v45, %v563_v28  ;;  %v490_v44 = vsel %vm479_vm0, %v487_v3, %v489_v2  ;;  %v452_v46 = vadd.f32 %v444_v34, %v1025_v57 }
  0xb0   : > { %637 = vst.msk [vmem:[%s1094_s18 + $0x4] sm:$0xf] %vm635_vm1, %v808_v31  ;;  %v577_v43 = vmul.f32 %v1064_v45, %v562_v33  ;;  %v541_v54 = vrot.slane %v522_v35, 1  ;;  %v814_v47 = vpack.c.bf16 %v602_v36, %v602_v36  ;;  %v451_v49 = vadd.f32 %v443_v40, %v1035_v16 }
  0xb1   : > { %636 = vst.msk [vmem:[%s1094_s18] sm:$0xf] %vm635_vm1, %v807_v38  ;;  %v593_v48 = vadd.f32 %v1072_v60, %v578_v39  ;;  %v521_v51 = vmul.f32 %v913_v30, %v1021_v55  ;;  %v507_v52 = vadd.f32 %v490_v44, %v452_v46  ;;  %v488_v57 = vsel %vm479_vm0, %v485_v20, %v487_v3 }
  0xb2   : > { %v592_v58 = vadd.f32 %v1072_v60, %v577_v43  ;;  %v544_v59 = vsel %vm479_vm0, %v541_v54, %v543_v18  ;;  %v647_v2 = vsel %vm1105_vm3, %v814_v47, %v646_v42  ;;  %v506_v16 = vadd.f32 %v488_v57, %v451_v49 }
  0xb3   : > { %v601_v61 = vmax.f32 %v593_v48, 0.0  ;;  %v539_v62 = vrot.slane %v521_v51, 1  ;;  %v505_v55 = vadd.f32 %v1053_v37, %v1067_v50  ;;  %648 = vst [vmem:[%s1094_s18 + $0x1c] sm:$0xf] %v647_v2  ;;  %v561_v0 = vadd.f32 %v544_v59, %v507_v52 }
  0xb4   : > { %v600_v63 = vmax.f32 %v592_v58, 0.0 }
  0xb5   : > { %v813_v1 = vpack.c.bf16 %v601_v61, %v601_v61  ;;  %v540_v53 = vsel %vm479_vm0, %v537_v32, %v539_v62  ;;  %v542_v3 = vsel %vm479_vm0, %v539_v62, %v541_v54  ;;  %v576_v20 = vmul.f32 %v1064_v45, %v561_v0 }
  0xb6   : > { %v812_v12 = vpack.c.bf16 %v600_v63, %v600_v63  ;;  %v559_v4 = vadd.f32 %v540_v53, %v505_v55  ;;  %v560_v5 = vadd.f32 %v542_v3, %v506_v16 }
  0xb7   : > { %642 = vst.msk [vmem:[%s1094_s18 + $0x18] sm:$0xf] %vm635_vm1, %v813_v1  ;;  %v591_v37 = vadd.f32 %v1072_v60, %v576_v20 }
  0xb8   : > { %641 = vst.msk [vmem:[%s1094_s18 + $0x14] sm:$0xf] %vm635_vm1, %v812_v12  ;;  %v574_v25 = vmul.f32 %v1064_v45, %v559_v4  ;;  %v575_v32 = vmul.f32 %v1064_v45, %v560_v5 }
  0xb9   : > { %v599_v50 = vmax.f32 %v591_v37, 0.0 }
  0xba   : > { %v589_v6 = vadd.f32 %v1072_v60, %v574_v25  ;;  %v590_v7 = vadd.f32 %v1072_v60, %v575_v32 }
  0xbb   : > { %v811_v8 = vpack.c.bf16 %v599_v50, %v599_v50 }
  0xbc   : > { %v597_v9 = vmax.f32 %v589_v6, 0.0  ;;  %v598_v11 = vmax.f32 %v590_v7, 0.0 }
  0xbd   : > { %640 = vst.msk [vmem:[%s1094_s18 + $0x10] sm:$0xf] %vm635_vm1, %v811_v8 }
  0xbe   : > { %v809_v13 = vpack.c.bf16 %v597_v9, %v597_v9  ;;  %v810_v14 = vpack.c.bf16 %v598_v11, %v598_v11 }
  0xc0   : > { %638 = vst.msk [vmem:[%s1094_s18 + $0x8] sm:$0xf] %vm635_vm1, %v809_v13  ;;  %639 = vst.msk [vmem:[%s1094_s18 + $0xc] sm:$0xf] %vm635_vm1, %v810_v14 }
  0xc1 PF: > { %s15_s20 = sadd.s32 1, %s942_s20   ;;  %s1171_s18 = smov %s938_s19 }
  0xc2   : > { %p12_p5 = scmp.ge.s32.totalorder %s15_s20, 4   ;;  %s1172_s19 = smov %s1174_s21 }
  0xc4   :  { %14 = sbr.rel (!%p12_p5) target bundleno = 2 (0x2), region = 85 }

// kernel: cnn_forward.6
= control target key start
LH: loop header
LB: loop body
LE: loop exit
PB: predicated region body
PF: predicated region fallthrough
CT: control target
= control target key end

     0   :  { %s1183_s18 = smov 0   ;;  %s1185_s19 = smov 0   ;;  %s1294_s0 = inlined_call_operand.vmem [shape: bf16[2,31,64], index: 0, kind: input, shape index: {}]   ;;  %s1295_s1 = inlined_call_operand.vmem [shape: bf16[2,31,64], index: 1, kind: input, shape index: {}]   ;;  %s1296_s2 = inlined_call_operand.vmem [shape: bf16[4,64,128], index: 2, kind: input, shape index: {}]   ;;  %s1297_s3 = inlined_call_operand.vmem [shape: f32[1,128], index: 3, kind: input, shape index: {}]   ;;  %s1298_s4 = inlined_call_operand.vmem [shape: f32[1,128], index: 4, kind: input, shape index: {}]   ;;  %s1299_s5 = inlined_call_operand.vmem [shape: bf16[2,30,128], index: 5, kind: output, shape index: {}]  }
   0x1   :  { %s1187_s20 = smov 0  }
   0x2 LB: > { %s27_s21 = sadd.s32 1, %s1147_s19  ;;  %p918_p0 = scmp.ge.s32.totalorder %s1151_s20, 1  ;;  %s1151_s20 = sphi %s1187_s20, %s15_s20   ;;  %s1147_s19 = sphi %s1185_s19, %s1301_s19   ;;  %s1143_s18 = sphi %s1183_s18, %s1300_s18  }
   0x3   : > { %p29_p1 = scmp.ge.s32.totalorder %s27_s21, 2  ;;  %p236_p2 = scmp.lt.s32.totalorder %s1151_s20, 3 }
   0x5   : > { %s1303_s21 = smov (%p29_p1, %s27_s21), 0  ;;  %p237_p3 = pnand %p918_p0, %p236_p2 }
   0x6   : > { %v1107_v0 = vld [vmem:[%s1296_s2 + $0x20] sm:$0xff] (!%p237_p3)   ;;  %p282_p4 = scmp.lt.s32.totalorder (!%p237_p3), %s1143_s18, 1  ;;  %v1109_v2 = vld [vmem:[%s1296_s2 + $0x28] sm:$0xff] (!%p237_p3)   ;;  %v1111_v4 = vld [vmem:[%s1296_s2 + $0x30] sm:$0xff] (!%p237_p3)   ;;  %vm370_vm0 = vcmask (!%p237_p3), 523264  }
   0x7   : > { %240 = sbr.rel (%p237_p3) target bundleno = 269 (0x10d), region = 40  ;;  %v1108_v1 = vld [vmem:[%s1296_s2 + $0x40] sm:$0xff] (!%p237_p3)   ;;  %1023 = vmatprep.subr.bf16.mxu1 (!%p237_p3), %v1107_v0  ;;  %v1110_v3 = vld [vmem:[%s1296_s2 + $0x48] sm:$0xff] (!%p237_p3)   ;;  %v1112_v5 = vld [vmem:[%s1296_s2 + $0x50] sm:$0xff] (!%p237_p3)   ;;  %vm528_vm1 = vsmask.f32 (!%p237_p3), 7424 }
   0x8   : > { %1047 = vmatprep.subr.bf16.mxu0 (!%p237_p3), %v1108_v1  ;;  %1024 = vmatpush3.bf16.msra.mxu1 (!%p237_p3), %v1107_v0  ;;  %v1113_v6 = vld [vmem:[%s1296_s2 + $0x38] sm:$0xff] (!%p237_p3)   ;;  %v1116_v11 = vld [vmem:[%s1296_s2] sm:$0xff] (!%p237_p3)   ;;  %v1123_v27 = vld [vmem:[%s1296_s2 + $0x8] sm:$0xff] (!%p237_p3)  }
   0x9   : > { %1048 = vmatpush3.bf16.msra.mxu0 (!%p237_p3), %v1108_v1  ;;  %1025 = vmatprep.subr.bf16.mxu1 (!%p237_p3), %v1109_v2  ;;  %v1114_v8 = vld [vmem:[%s1296_s2 + $0x58] sm:$0xff] (!%p237_p3)   ;;  %v1120_v16 = vld [vmem:[%s1296_s2 + $0x60] sm:$0xff] (!%p237_p3)   ;;  %v1124_v33 = vld [vmem:[%s1296_s2 + $0x68] sm:$0xff] (!%p237_p3)  }
   0xa   : > { %1049 = vmatprep.subr.bf16.mxu0 (!%p237_p3), %v1110_v3  ;;  %v1125_v36 = vld [vmem:[%s1296_s2 + $0x10] sm:$0xff] (!%p237_p3)   ;;  %v1127_v40 = vld [vmem:[%s1296_s2 + $0x18] sm:$0xff] (!%p237_p3)   ;;  %v979_v50 = vld [vmem:[%s1297_s3] ss:$0 sm:$0xff] (!%p237_p3) }
   0xb   : > { %v1126_v38 = vld [vmem:[%s1296_s2 + $0x70] sm:$0xff] (!%p237_p3)   ;;  %v1128_v42 = vld [vmem:[%s1296_s2 + $0x78] sm:$0xff] (!%p237_p3)   ;;  %v980_v54 = vld [vmem:[%s1298_s4] ss:$0 sm:$0xff] (!%p237_p3) }
   0xc   : > { %1026 = vmatpush3.bf16.msra.mxu1 (!%p237_p3), %v1109_v2 }
   0xd   : > { %1050 = vmatpush3.bf16.msra.mxu0 (!%p237_p3), %v1110_v3  ;;  %1027 = vmatprep.subr.bf16.mxu1 (!%p237_p3), %v1111_v4 }
   0xe   : > { %s1305_s18 = smov (!%p282_p4, %s1143_s18), 1  ;;  %1051 = vmatprep.subr.bf16.mxu0 %v1112_v5 }
   0xf   : > { %s1216_s7 = sshll.u32 %s1305_s18, 4 }
  0x10   : > { %s291_s12 = scalar_lea.vmem %s1295_s1, %s1216_s7  ;;  %s1232_s17 = scalar_lea.vmem %s1294_s0, %s1216_s7  ;;  %1028 = vmatpush3.bf16.msra.mxu1 %v1111_v4 }
  0x11   : > { %v1115_v7 = vld [vmem:[%s291_s12] sm:$0xff]   ;;  %v313_v12 = vld [vmem:[%s1232_s17 + $0x8] sm:$0xf]  ;;  %1052 = vmatpush3.bf16.msra.mxu0 %v1112_v5  ;;  %1029 = vmatprep.subr.bf16.mxu1 %v1113_v6  ;;  %v515_v15 = vld [vmem:[%s1232_s17 + $0xc] sm:$0xf]  ;;  %s309_s24 = scalar_lea.vmem %s1299_s5, %s1216_s7 }
  0x12   : > { %1031 = vmatprep.mubr.msk.bf16.mxu1 %vm370_vm0, %v1115_v7  ;;  %v641_v9 = vshll.u32 %v1115_v7, 16  ;;  %v639_v10 = vshrl.u32 %v1115_v7, 16  ;;  %v1117_v13 = vld [vmem:[%s1232_s17] sm:$0xff]   ;;  %1053 = vmatprep.subr.bf16.mxu0 %v1114_v8  ;;  %v957_v17 = vcombine.low %v313_v12, %v515_v15  ;;  %v325_v20 = vld [vmem:[%s291_s12 + $0x8] sm:$0xf] }
  0x13   : > { %v529_v18 = vshrl.u32 %v1117_v13, 16  ;;  %v531_v19 = vshll.u32 %v1117_v13, 16  ;;  %v326_v21 = vld [vmem:[%s291_s12 + $0xc] sm:$0x7] }
  0x14   : > { %v643_v14 = vrot.slane %v641_v9, 1  ;;  %v626_v22 = vld [vmem:[%s291_s12 + $0xc] sm:$0xf]  ;;  %1030 = vmatpush3.bf16.msra.mxu1 %v1113_v6  ;;  %v536_v24 = vshll.u32 %v957_v17, 16  ;;  %v540_v25 = vshrl.u32 %v957_v17, 16  ;;  %v934_v26 = vcombine.low %v325_v20, %v326_v21 }
  0x15   : > { %v533_v23 = vrot.slane %v531_v19, 1  ;;  %1054 = vmatpush3.bf16.msra.mxu0 %v1114_v8  ;;  %1035 = vmatprep.subr.bf16.mxu1 %v1116_v11  ;;  %v972_v28 = vcombine.low %v325_v20, %v626_v22  ;;  %v314_v41 = vld [vmem:[%s1232_s17 + $0xc] sm:$0x7] }
  0x16   : > { %v538_v30 = vrot.slane %v536_v24, 1  ;;  %1059 = vmatprep.subr.bf16.mxu0 %v1120_v16  ;;  %v644_v34 = vor.u32 %v643_v14, %v639_v10  ;;  %v942_v44 = vcombine.low %v313_v12, %v314_v41 }
  0x17   : > { %v534_v29 = vor.u32 %v533_v23, %v529_v18  ;;  %1032 = vmatmul.mubr.msk.bf16.vlgmr.msra.gmra.mrb[0].mxu1 %vm370_vm0, %v934_v26  ;;  %v646_v35 = vshll.u32 %v972_v28, 16  ;;  %v650_v43 = vshrl.u32 %v972_v28, 16 }
  0x18   : > { %v542_v32 = vor.u32 %v540_v25, %v538_v30  ;;  %1036 = vmatpush3.bf16.msra.mxu1 %v1116_v11  ;;  %1043 = vmatprep.mubr.msk.bf16.mxu1 %vm370_vm0, %v1117_v13 }
  0x19   : > { %v539_v31 = vsel %vm528_vm1, %v534_v29, %v538_v30  ;;  %1037 = vmatprep.subr.bf16.mxu1 %v1123_v27  ;;  %v648_v37 = vrot.slane %v646_v35, 1 }
  0x1a   : > { %1055 = vmatprep.mubr.msk.bf16.mxu0 %vm370_vm0, %v539_v31 }
  0x1b   : > { %1056 = vmatmul.mubr.msk.bf16.vlgmr.msra.gmra.mrb[0].mxu0 %vm370_vm0, %v542_v32  ;;  %v649_v39 = vsel %vm528_vm1, %v644_v34, %v648_v37  ;;  %v652_v45 = vor.u32 %v650_v43, %v648_v37 }
  0x1c   : > { %1060 = vmatpush3.bf16.msra.mxu0 %v1120_v16  ;;  %1038 = vmatpush3.bf16.msra.mxu1 %v1123_v27 }
  0x1d   : > { %1061 = vmatprep.subr.bf16.mxu0 %v1124_v33  ;;  %1039 = vmatprep.subr.bf16.mxu1 %v1125_v36 }
  0x1e   : > { %1067 = vmatprep.mubr.msk.bf16.mxu0 %vm370_vm0, %v649_v39 }
  0x20   : > { %1062 = vmatpush3.bf16.msra.mxu0 %v1124_v33  ;;  %1040 = vmatpush3.bf16.msra.mxu1 %v1125_v36 }
  0x21   : > { %1063 = vmatprep.subr.bf16.mxu0 %v1126_v38  ;;  %1041 = vmatprep.subr.bf16.mxu1 %v1127_v40 }
  0x24   : > { %1064 = vmatpush3.bf16.msra.mxu0 %v1126_v38  ;;  %1042 = vmatpush3.bf16.msra.mxu1 %v1127_v40 }
  0x25   : > { %1065 = vmatprep.subr.bf16.mxu0 %v1128_v42 }
  0x27   : > { %1044 = vmatmul.mubr.msk.bf16.vlgmr.msra.gmra.mrb[0].mxu1 %vm370_vm0, %v942_v44 }
  0x28   : > { %1066 = vmatpush3.bf16.msra.mxu0 %v1128_v42 }
  0x2b   : > { %1068 = vmatmul.mubr.msk.bf16.vlgmr.msra.gmra.mrb[0].mxu0 %vm370_vm0, %v652_v45 }
  0xfa   : > { %v1045_v46 = vpop.f32.mrb[0].mxu1 }
  0xfb   : > { %v500_v47 = vpop.f32.mrb[1].mxu1 }
  0xfc   : > { %v1046_v48 = vpop.f32.mrb[2].mxu1 }
  0xfd   : > { %v503_v51 = vpop.f32.mrb[3].mxu1 }
  0xfe   : > { %v1069_v49 = vpop.f32.mrb[0].mxu0 }
  0xff   : > { %v1071_v52 = vadd.f32 %v1069_v49, %v1045_v46  ;;  %v717_v53 = vpop.f32.mrb[1].mxu0 }
 0x100   : > { %v1072_v55 = vadd.f32 %v717_v53, %v500_v47  ;;  %v1070_v56 = vpop.f32.mrb[2].mxu0 }
 0x101   : > { %v745_v57 = vmul.f32 %v1071_v52, %v979_v50  ;;  %v1073_v58 = vadd.f32 %v1070_v56, %v1046_v48  ;;  %v720_v59 = vpop.f32.mrb[3].mxu0 }
 0x102   : > { %v743_v60 = vmul.f32 %v1072_v55, %v979_v50  ;;  %v1074_v61 = vadd.f32 %v720_v59, %v503_v51 }
 0x103   : > { %v756_v62 = vadd.f32 %v980_v54, %v745_v57  ;;  %v746_v63 = vmul.f32 %v1073_v58, %v979_v50 }
 0x104   : > { %v754_v0 = vadd.f32 %v980_v54, %v743_v60  ;;  %v744_v1 = vmul.f32 %v1074_v61, %v979_v50 }
 0x105   : > { %v760_v2 = vmax.f32 %v756_v62, 0.0  ;;  %v757_v3 = vadd.f32 %v980_v54, %v746_v63 }
 0x106   : > { %v755_v4 = vadd.f32 %v980_v54, %v744_v1  ;;  %v758_v7 = vmax.f32 %v754_v0, 0.0 }
 0x107   : > { %v992_v5 = vpack.c.bf16 %v760_v2, %v760_v2  ;;  %v761_v6 = vmax.f32 %v757_v3, 0.0 }
 0x108   : > { %v759_v8 = vmax.f32 %v755_v4, 0.0 }
 0x109   : > { %780 = vst [vmem:[%s309_s24 + $0x8] sm:$0xf] %v992_v5  ;;  %v993_v9 = vpack.c.bf16 %v761_v6, %v761_v6 }
 0x10a   : > { %v997_v10 = vpack.c.bf16 %v759_v8, %v758_v7 }
 0x10b   : > { %781 = vst [vmem:[%s309_s24 + $0xc] sm:$0x7] %v993_v9 }
 0x10c   : > { %998 = vst [vmem:[%s309_s24] sm:$0xff] %v997_v10  }
 0x10d PF: > { %s15_s20 = sadd.s32 1, %s1151_s20   ;;  %s1300_s18 = smov %s1147_s19 }
 0x10e   : > { %p12_p5 = scmp.ge.s32.totalorder %s15_s20, 4   ;;  %s1301_s19 = smov %s1303_s21 }
 0x110   :  { %14 = sbr.rel (!%p12_p5) target bundleno = 2 (0x2), region = 85 }

// kernel: cnn_forward.7
= control target key start
LH: loop header
LB: loop body
LE: loop exit
PB: predicated region body
PF: predicated region fallthrough
CT: control target
= control target key end

     0   :  { %s1708_s18 = smov 0   ;;  %s1710_s19 = smov 0   ;;  %s2062_s0 = inlined_call_operand.vmem [shape: bf16[2,15,128], index: 0, kind: input, shape index: {}]   ;;  %s2063_s1 = inlined_call_operand.vmem [shape: bf16[2,15,128], index: 1, kind: input, shape index: {}]   ;;  %s2064_s2 = inlined_call_operand.vmem [shape: bf16[4,128,256], index: 2, kind: input, shape index: {}]   ;;  %s2065_s3 = inlined_call_operand.vmem [shape: f32[1,256], index: 3, kind: input, shape index: {}]   ;;  %s2066_s4 = inlined_call_operand.vmem [shape: f32[1,256], index: 4, kind: input, shape index: {}]   ;;  %s2067_s5 = inlined_call_operand.vmem [shape: bf16[2,14,256], index: 5, kind: output, shape index: {}]  }
   0x1   :  { %s1712_s20 = smov 0   ;;  %s1714_s21 = smov 0  }
   0x2   :  { %s1716_s22 = smov 0   ;;  %s1718_s23 = smov 0  }
   0x3   :  { %s1720_s24 = smov 0   ;;  %s1722_s25 = smov 0  }
   0x4   :  { %s1724_s26 = smov 0  }
   0x5 LB: > { %s1258_s27 = sadd.s32 4294967295, %s1674_s26   ;;  %s24_s28 = sadd.s32 1, %s1666_s24  ;;  %s1674_s26 = sphi %s1724_s26, %s15_s26   ;;  %s1670_s25 = sphi %s1722_s25, %s2076_s25   ;;  %s1666_s24 = sphi %s1720_s24, %s2075_s24   ;;  %s1662_s23 = sphi %s1718_s23, %s2074_s23   ;;  %s1658_s22 = sphi %s1716_s22, %s2073_s22   ;;  %s1654_s21 = sphi %s1714_s21, %s2072_s21   ;;  %s1650_s20 = sphi %s1712_s20, %s2071_s20   ;;  %s1646_s19 = sphi %s1710_s19, %s2070_s19   ;;  %s1642_s18 = sphi %s1708_s18, %s2069_s18  }
   0x6   : > { %p25_p0 = scmp.ge.s32.totalorder %s24_s28, 2  ;;  %s27_s29 = sadd.s32 1, %s1670_s25 }
   0x7   : > { %s86_s30 = sadd.s32 1, %s1654_s21  ;;  %p93_p1 = scmp.ne.s32.totalorder %s1654_s21, %s1650_s20 }
   0x8   : > { %s2078_s28 = smov (%p25_p0, %s24_s28), 0  ;;  %s2080_s29 = smov (!%p25_p0, %s27_s29), %s1670_s25 }
   0x9   : > { %s83_s6 = ssub.s32 %s1666_s24, %s2078_s28  ;;  %p94_p2 = scmp.eq.s32.totalorder %s1674_s26, 0 }
   0xa   : > { %p29_p3 = scmp.ge.s32.totalorder %s2080_s29, 2  ;;  %p84_p4 = scmp.eq.s32.totalorder %s83_s6, 0 }
   0xb   : > { %p95_p5 = por %p94_p2, %p93_p1  ;;  %s166_s7 = sadd.s32 1, %s1646_s19 }
   0xc   : > { %s2082_s29 = smov (%p29_p3, %s2080_s29), 0  ;;  %p176_p6 = scmp.ne.s32.totalorder %s1646_s19, %s1642_s18 }
   0xd   : > { %s1769_s8 = scalar_select %p84_p4, %s1654_s21, %s86_s30  }
   0xe   : > { %s161_s9 = ssub.s32 %s1670_s25, %s2082_s29  ;;  %p177_p7 = scmp.eq.s32.totalorder %s1258_s27, 3 }
   0xf   : > { %s163_s10 = sor.u32 %s161_s9, %s83_s6  ;;  %p1261_p10 = scmp.ge.s32.totalorder %s1674_s26, 4 }
  0x10   : > { %p164_p8 = scmp.eq.s32.totalorder %s163_s10, 0  ;;  %p1775_p9 = por %p177_p7, %p176_p6 }
  0x11   : > { %199 = sbr.rel (%p1261_p10) target bundleno = 70 (0x46), region = 16 }
  0x12   : > { %s1780_s12 = scalar_select %p164_p8, %s1646_s19, %s166_s7  }
  0x18   : > { %218 = sbr.rel (!%p95_p5) target bundleno = 70 (0x46), region = 28  ;;  %s220_s13 = sand.u32 (%p95_p5), 1, %s1654_s21  }
  0x19   : > { %s1263_s14 = sshll.u32 (%p95_p5), %s1666_s24, 2  ;;  %s1262_s15 = sshll.u32 (%p95_p5), %s220_s13, 8 }
  0x1a   : > { %s1788_s27 = scalar_lea.vmem (%p95_p5), %s2064_s2, %s1263_s14  ;;  %s1792_s30 = scalar_lea.vmem (%p95_p5), [#allocation2], %s1262_s15 }
  0x1b   : > { %v240_v0 = vld [vmem:[%s1788_s27] sm:$0xf] (%p95_p5)  ;;  %v242_v1 = vld [vmem:[%s1788_s27 + $0x8] sm:$0xf] (%p95_p5)  ;;  %v244_v2 = vld [vmem:[%s1788_s27 + $0x10] sm:$0xf] (%p95_p5) }
  0x1c   : > { %241 = vst [vmem:[%s1792_s30] sm:$0xf] (%p95_p5), %v240_v0  ;;  %243 = vst [vmem:[%s1792_s30 + $0x4] sm:$0xf] (%p95_p5), %v242_v1  ;;  %v246_v3 = vld [vmem:[%s1788_s27 + $0x18] sm:$0xf] (%p95_p5) }
  0x1d   : > { %v248_v4 = vld [vmem:[%s1788_s27 + $0x20] sm:$0xf] (%p95_p5)  ;;  %245 = vst [vmem:[%s1792_s30 + $0x8] sm:$0xf] (%p95_p5), %v244_v2  ;;  %247 = vst [vmem:[%s1792_s30 + $0xc] sm:$0xf] (%p95_p5), %v246_v3 }
  0x1e   : > { %249 = vst [vmem:[%s1792_s30 + $0x10] sm:$0xf] (%p95_p5), %v248_v4  ;;  %v250_v5 = vld [vmem:[%s1788_s27 + $0x28] sm:$0xf] (%p95_p5)  ;;  %v252_v6 = vld [vmem:[%s1788_s27 + $0x30] sm:$0xf] (%p95_p5) }
  0x1f   : > { %v254_v7 = vld [vmem:[%s1788_s27 + $0x38] sm:$0xf]  ;;  %251 = vst [vmem:[%s1792_s30 + $0x14] sm:$0xf] %v250_v5  ;;  %253 = vst [vmem:[%s1792_s30 + $0x18] sm:$0xf] %v252_v6 }
  0x20   : > { %255 = vst [vmem:[%s1792_s30 + $0x1c] sm:$0xf] %v254_v7  ;;  %v256_v8 = vld [vmem:[%s1788_s27 + $0x40] sm:$0xf]  ;;  %v258_v9 = vld [vmem:[%s1788_s27 + $0x48] sm:$0xf] }
  0x21   : > { %v260_v10 = vld [vmem:[%s1788_s27 + $0x50] sm:$0xf]  ;;  %257 = vst [vmem:[%s1792_s30 + $0x20] sm:$0xf] %v256_v8  ;;  %259 = vst [vmem:[%s1792_s30 + $0x24] sm:$0xf] %v258_v9 }
  0x22   : > { %261 = vst [vmem:[%s1792_s30 + $0x28] sm:$0xf] %v260_v10  ;;  %v262_v11 = vld [vmem:[%s1788_s27 + $0x58] sm:$0xf]  ;;  %v264_v12 = vld [vmem:[%s1788_s27 + $0x60] sm:$0xf] }
  0x23   : > { %v266_v13 = vld [vmem:[%s1788_s27 + $0x68] sm:$0xf]  ;;  %263 = vst [vmem:[%s1792_s30 + $0x2c] sm:$0xf] %v262_v11  ;;  %265 = vst [vmem:[%s1792_s30 + $0x30] sm:$0xf] %v264_v12 }
  0x24   : > { %267 = vst [vmem:[%s1792_s30 + $0x34] sm:$0xf] %v266_v13  ;;  %v268_v14 = vld [vmem:[%s1788_s27 + $0x70] sm:$0xf]  ;;  %v270_v15 = vld [vmem:[%s1788_s27 + $0x78] sm:$0xf] }
  0x25   : > { %v272_v16 = vld [vmem:[%s1788_s27 + $0x80] sm:$0xf]  ;;  %269 = vst [vmem:[%s1792_s30 + $0x38] sm:$0xf] %v268_v14  ;;  %271 = vst [vmem:[%s1792_s30 + $0x3c] sm:$0xf] %v270_v15 }
  0x26   : > { %273 = vst [vmem:[%s1792_s30 + $0x40] sm:$0xf] %v272_v16  ;;  %v274_v17 = vld [vmem:[%s1788_s27 + $0x88] sm:$0xf]  ;;  %v276_v18 = vld [vmem:[%s1788_s27 + $0x90] sm:$0xf] }
  0x27   : > { %v278_v19 = vld [vmem:[%s1788_s27 + $0x98] sm:$0xf]  ;;  %275 = vst [vmem:[%s1792_s30 + $0x44] sm:$0xf] %v274_v17  ;;  %277 = vst [vmem:[%s1792_s30 + $0x48] sm:$0xf] %v276_v18 }
  0x28   : > { %279 = vst [vmem:[%s1792_s30 + $0x4c] sm:$0xf] %v278_v19  ;;  %v280_v20 = vld [vmem:[%s1788_s27 + $0xa0] sm:$0xf]  ;;  %v282_v21 = vld [vmem:[%s1788_s27 + $0xa8] sm:$0xf] }
  0x29   : > { %v284_v22 = vld [vmem:[%s1788_s27 + $0xb0] sm:$0xf]  ;;  %281 = vst [vmem:[%s1792_s30 + $0x50] sm:$0xf] %v280_v20  ;;  %283 = vst [vmem:[%s1792_s30 + $0x54] sm:$0xf] %v282_v21 }
  0x2a   : > { %285 = vst [vmem:[%s1792_s30 + $0x58] sm:$0xf] %v284_v22  ;;  %v286_v23 = vld [vmem:[%s1788_s27 + $0xb8] sm:$0xf]  ;;  %v288_v24 = vld [vmem:[%s1788_s27 + $0xc0] sm:$0xf] }
  0x2b   : > { %v290_v25 = vld [vmem:[%s1788_s27 + $0xc8] sm:$0xf]  ;;  %287 = vst [vmem:[%s1792_s30 + $0x5c] sm:$0xf] %v286_v23  ;;  %289 = vst [vmem:[%s1792_s30 + $0x60] sm:$0xf] %v288_v24 }
  0x2c   : > { %291 = vst [vmem:[%s1792_s30 + $0x64] sm:$0xf] %v290_v25  ;;  %v292_v26 = vld [vmem:[%s1788_s27 + $0xd0] sm:$0xf]  ;;  %v294_v27 = vld [vmem:[%s1788_s27 + $0xd8] sm:$0xf] }
  0x2d   : > { %v296_v28 = vld [vmem:[%s1788_s27 + $0xe0] sm:$0xf]  ;;  %293 = vst [vmem:[%s1792_s30 + $0x68] sm:$0xf] %v292_v26  ;;  %295 = vst [vmem:[%s1792_s30 + $0x6c] sm:$0xf] %v294_v27 }
  0x2e   : > { %297 = vst [vmem:[%s1792_s30 + $0x70] sm:$0xf] %v296_v28  ;;  %v298_v29 = vld [vmem:[%s1788_s27 + $0xe8] sm:$0xf]  ;;  %v300_v30 = vld [vmem:[%s1788_s27 + $0xf0] sm:$0xf] }
  0x2f   : > { %v302_v31 = vld [vmem:[%s1788_s27 + $0xf8] sm:$0xf]  ;;  %299 = vst [vmem:[%s1792_s30 + $0x74] sm:$0xf] %v298_v29  ;;  %301 = vst [vmem:[%s1792_s30 + $0x78] sm:$0xf] %v300_v30 }
  0x30   : > { %303 = vst [vmem:[%s1792_s30 + $0x7c] sm:$0xf] %v302_v31  ;;  %v304_v32 = vld [vmem:[%s1788_s27 + $0x100] sm:$0xf]  ;;  %v306_v33 = vld [vmem:[%s1788_s27 + $0x108] sm:$0xf] }
  0x31   : > { %v308_v34 = vld [vmem:[%s1788_s27 + $0x110] sm:$0xf]  ;;  %305 = vst [vmem:[%s1792_s30 + $0x80] sm:$0xf] %v304_v32  ;;  %307 = vst [vmem:[%s1792_s30 + $0x84] sm:$0xf] %v306_v33 }
  0x32   : > { %309 = vst [vmem:[%s1792_s30 + $0x88] sm:$0xf] %v308_v34  ;;  %v310_v35 = vld [vmem:[%s1788_s27 + $0x118] sm:$0xf]  ;;  %v312_v36 = vld [vmem:[%s1788_s27 + $0x120] sm:$0xf] }
  0x33   : > { %v314_v37 = vld [vmem:[%s1788_s27 + $0x128] sm:$0xf]  ;;  %311 = vst [vmem:[%s1792_s30 + $0x8c] sm:$0xf] %v310_v35  ;;  %313 = vst [vmem:[%s1792_s30 + $0x90] sm:$0xf] %v312_v36 }
  0x34   : > { %315 = vst [vmem:[%s1792_s30 + $0x94] sm:$0xf] %v314_v37  ;;  %v316_v38 = vld [vmem:[%s1788_s27 + $0x130] sm:$0xf]  ;;  %v318_v39 = vld [vmem:[%s1788_s27 + $0x138] sm:$0xf] }
  0x35   : > { %v320_v40 = vld [vmem:[%s1788_s27 + $0x140] sm:$0xf]  ;;  %317 = vst [vmem:[%s1792_s30 + $0x98] sm:$0xf] %v316_v38  ;;  %319 = vst [vmem:[%s1792_s30 + $0x9c] sm:$0xf] %v318_v39 }
  0x36   : > { %321 = vst [vmem:[%s1792_s30 + $0xa0] sm:$0xf] %v320_v40  ;;  %v322_v41 = vld [vmem:[%s1788_s27 + $0x148] sm:$0xf]  ;;  %v324_v42 = vld [vmem:[%s1788_s27 + $0x150] sm:$0xf] }
  0x37   : > { %v326_v43 = vld [vmem:[%s1788_s27 + $0x158] sm:$0xf]  ;;  %323 = vst [vmem:[%s1792_s30 + $0xa4] sm:$0xf] %v322_v41  ;;  %325 = vst [vmem:[%s1792_s30 + $0xa8] sm:$0xf] %v324_v42 }
  0x38   : > { %327 = vst [vmem:[%s1792_s30 + $0xac] sm:$0xf] %v326_v43  ;;  %v328_v44 = vld [vmem:[%s1788_s27 + $0x160] sm:$0xf]  ;;  %v330_v45 = vld [vmem:[%s1788_s27 + $0x168] sm:$0xf] }
  0x39   : > { %v332_v46 = vld [vmem:[%s1788_s27 + $0x170] sm:$0xf]  ;;  %329 = vst [vmem:[%s1792_s30 + $0xb0] sm:$0xf] %v328_v44  ;;  %331 = vst [vmem:[%s1792_s30 + $0xb4] sm:$0xf] %v330_v45 }
  0x3a   : > { %333 = vst [vmem:[%s1792_s30 + $0xb8] sm:$0xf] %v332_v46  ;;  %v334_v47 = vld [vmem:[%s1788_s27 + $0x178] sm:$0xf]  ;;  %v336_v48 = vld [vmem:[%s1788_s27 + $0x180] sm:$0xf] }
  0x3b   : > { %v338_v49 = vld [vmem:[%s1788_s27 + $0x188] sm:$0xf]  ;;  %335 = vst [vmem:[%s1792_s30 + $0xbc] sm:$0xf] %v334_v47  ;;  %337 = vst [vmem:[%s1792_s30 + $0xc0] sm:$0xf] %v336_v48 }
  0x3c   : > { %339 = vst [vmem:[%s1792_s30 + $0xc4] sm:$0xf] %v338_v49  ;;  %v340_v50 = vld [vmem:[%s1788_s27 + $0x190] sm:$0xf]  ;;  %v342_v51 = vld [vmem:[%s1788_s27 + $0x198] sm:$0xf] }
  0x3d   : > { %v344_v52 = vld [vmem:[%s1788_s27 + $0x1a0] sm:$0xf]  ;;  %341 = vst [vmem:[%s1792_s30 + $0xc8] sm:$0xf] %v340_v50  ;;  %343 = vst [vmem:[%s1792_s30 + $0xcc] sm:$0xf] %v342_v51 }
  0x3e   : > { %345 = vst [vmem:[%s1792_s30 + $0xd0] sm:$0xf] %v344_v52  ;;  %v346_v53 = vld [vmem:[%s1788_s27 + $0x1a8] sm:$0xf]  ;;  %v348_v54 = vld [vmem:[%s1788_s27 + $0x1b0] sm:$0xf] }
  0x3f   : > { %v350_v55 = vld [vmem:[%s1788_s27 + $0x1b8] sm:$0xf]  ;;  %347 = vst [vmem:[%s1792_s30 + $0xd4] sm:$0xf] %v346_v53  ;;  %349 = vst [vmem:[%s1792_s30 + $0xd8] sm:$0xf] %v348_v54 }
  0x40   : > { %351 = vst [vmem:[%s1792_s30 + $0xdc] sm:$0xf] %v350_v55  ;;  %v352_v56 = vld [vmem:[%s1788_s27 + $0x1c0] sm:$0xf]  ;;  %v354_v57 = vld [vmem:[%s1788_s27 + $0x1c8] sm:$0xf] }
  0x41   : > { %v356_v58 = vld [vmem:[%s1788_s27 + $0x1d0] sm:$0xf]  ;;  %353 = vst [vmem:[%s1792_s30 + $0xe0] sm:$0xf] %v352_v56  ;;  %355 = vst [vmem:[%s1792_s30 + $0xe4] sm:$0xf] %v354_v57 }
  0x42   : > { %357 = vst [vmem:[%s1792_s30 + $0xe8] sm:$0xf] %v356_v58  ;;  %v358_v59 = vld [vmem:[%s1788_s27 + $0x1d8] sm:$0xf]  ;;  %v360_v60 = vld [vmem:[%s1788_s27 + $0x1e0] sm:$0xf] }
  0x43   : > { %v362_v61 = vld [vmem:[%s1788_s27 + $0x1e8] sm:$0xf]  ;;  %359 = vst [vmem:[%s1792_s30 + $0xec] sm:$0xf] %v358_v59  ;;  %361 = vst [vmem:[%s1792_s30 + $0xf0] sm:$0xf] %v360_v60 }
  0x44   : > { %363 = vst [vmem:[%s1792_s30 + $0xf4] sm:$0xf] %v362_v61  ;;  %v364_v62 = vld [vmem:[%s1788_s27 + $0x1f0] sm:$0xf]  ;;  %v366_v63 = vld [vmem:[%s1788_s27 + $0x1f8] sm:$0xf] }
  0x45   : > { %365 = vst [vmem:[%s1792_s30 + $0xf8] sm:$0xf] %v364_v62  ;;  %367 = vst [vmem:[%s1792_s30 + $0xfc] sm:$0xf] %v366_v63 }
  0x46 PF: > { %p1264_p11 = scmp.ge.s32.totalorder %s1674_s26, 1  ;;  %p529_p12 = scmp.lt.s32.totalorder %s1674_s26, 5 }
  0x48   : > { %p530_p13 = pnand %p1264_p11, %p529_p12 }
  0x49   : > { %s536_s6 = sand.u32 (!%p530_p13), 1, %s1650_s20   ;;  %v1676_v0 = vmov (!%p530_p13), 0.0   ;;  %vm1677_vm0 = vmmov (!%p530_p13), 0   ;;  %p578_p0 = scmp.lt.s32.totalorder (!%p530_p13), %s1662_s23, 1 }
  0x4a   : > { %533 = sbr.rel (%p530_p13) target bundleno = 374 (0x176), region = 77  ;;  %1404 = vmatprep.subr.bf16.mxu1 (!%p530_p13), %v1676_v0  ;;  %1444 = vmatprep.subr.bf16.mxu0 (!%p530_p13), %v1676_v0  ;;  %s1265_s7 = sshll.u32 (!%p530_p13), %s536_s6, 8 }
  0x4b   : > { %1420 = vmatprep.mubr.msk.bf16.mxu1 (!%p530_p13), %vm1677_vm0, %v1676_v0  ;;  %1460 = vmatprep.mubr.msk.bf16.mxu0 (!%p530_p13), %vm1677_vm0, %v1676_v0  ;;  %s1929_s9 = scalar_lea.vmem (!%p530_p13), [#allocation2], %s1265_s7  ;;  %p588_p1 = scmp.lt.s32.totalorder (!%p530_p13), %s1658_s22, 1 }
  0x4c   : > { %v1568_v1 = vld [vmem:[%s1929_s9 + $0x40] sm:$0xff] (!%p530_p13)   ;;  %v1570_v3 = vld [vmem:[%s1929_s9 + $0x48] sm:$0xff] (!%p530_p13)   ;;  %v1572_v5 = vld [vmem:[%s1929_s9 + $0x50] sm:$0xff] (!%p530_p13)   ;;  %s575_s14 = sand.u32 (!%p530_p13), 1, %s1642_s18  }
  0x4d   : > { %v1569_v2 = vld [vmem:[%s1929_s9 + $0x80] sm:$0xff] (!%p530_p13)   ;;  %1405 = vmatpush3.bf16.msra.mxu1 (!%p530_p13), %v1568_v1  ;;  %v1571_v4 = vld [vmem:[%s1929_s9 + $0x88] sm:$0xff] (!%p530_p13)   ;;  %v1573_v6 = vld [vmem:[%s1929_s9 + $0x90] sm:$0xff] (!%p530_p13)  }
  0x4e   : > { %1445 = vmatpush3.bf16.msra.mxu0 (!%p530_p13), %v1569_v2  ;;  %1406 = vmatprep.subr.bf16.mxu1 (!%p530_p13), %v1676_v0  ;;  %v1574_v7 = vld [vmem:[%s1929_s9 + $0x58] sm:$0xff] (!%p530_p13)   ;;  %v1576_v9 = vld [vmem:[%s1929_s9 + $0x60] sm:$0xff] (!%p530_p13)   ;;  %v1578_v11 = vld [vmem:[%s1929_s9 + $0x68] sm:$0xff] (!%p530_p13)  }
  0x4f   : > { %1446 = vmatprep.subr.bf16.mxu0 (!%p530_p13), %v1676_v0  ;;  %v1575_v8 = vld [vmem:[%s1929_s9 + $0x98] sm:$0xff] (!%p530_p13)   ;;  %v1577_v10 = vld [vmem:[%s1929_s9 + $0xa0] sm:$0xff] (!%p530_p13)   ;;  %v1579_v14 = vld [vmem:[%s1929_s9 + $0xa8] sm:$0xff] (!%p530_p13)  }
  0x50   : > { %v1580_v16 = vld [vmem:[%s1929_s9 + $0x70] sm:$0xff] (!%p530_p13)   ;;  %v1582_v19 = vld [vmem:[%s1929_s9 + $0x78] sm:$0xff] (!%p530_p13)   ;;  %v1586_v26 = vld [vmem:[%s1929_s9] sm:$0xff] (!%p530_p13)  }
  0x51   : > { %1407 = vmatpush3.bf16.msra.mxu1 %v1570_v3  ;;  %s579_s20 = scalar_select %p578_p0, %s1662_s23, 1  ;;  %v1581_v18 = vld [vmem:[%s1929_s9 + $0xb0] sm:$0xff]   ;;  %v1583_v24 = vld [vmem:[%s1929_s9 + $0xb8] sm:$0xff]   ;;  %v1588_v28 = vld [vmem:[%s1929_s9 + $0xc0] sm:$0xff]  }
  0x52   : > { %1447 = vmatpush3.bf16.msra.mxu0 %v1571_v4  ;;  %1408 = vmatprep.subr.bf16.mxu1 %v1676_v0  ;;  %v1589_v29 = vld [vmem:[%s1929_s9 + $0x8] sm:$0xff]   ;;  %v1591_v31 = vld [vmem:[%s1929_s9 + $0x10] sm:$0xff]   ;;  %v1593_v33 = vld [vmem:[%s1929_s9 + $0x18] sm:$0xff]   ;;  %s589_s30 = scalar_select %p588_p1, %s1658_s22, 1 }
  0x53   : > { %1448 = vmatprep.subr.bf16.mxu0 %v1676_v0  ;;  %s1364_s10 = sshll.u32 %s579_s20, 3  ;;  %v1590_v30 = vld [vmem:[%s1929_s9 + $0xc8] sm:$0xff]   ;;  %v1592_v32 = vld [vmem:[%s1929_s9 + $0xd0] sm:$0xff]   ;;  %v1594_v34 = vld [vmem:[%s1929_s9 + $0xd8] sm:$0xff]   ;;  %s1360_s18 = sshll.u32 (%p1775_p9), %s1662_s23, 2 }
  0x54   : > { %s1953_s15 = scalar_lea.vmem %s2062_s0, %s1364_s10  ;;  %s1968_s27 = scalar_lea.vmem %s2063_s1, %s1364_s10  ;;  %v1595_v35 = vld [vmem:[%s1929_s9 + $0x20] sm:$0xff]   ;;  %v1597_v39 = vld [vmem:[%s1929_s9 + $0x28] sm:$0xff]   ;;  %v1599_v42 = vld [vmem:[%s1929_s9 + $0x30] sm:$0xff]  }
  0x55   : > { %1409 = vmatpush3.bf16.msra.mxu1 %v1572_v5  ;;  %v1958_v12 = vld [vmem:[%s1953_s15] sm:$0xf]  ;;  %v822_v13 = vld [vmem:[%s1953_s15 + $0x4] sm:$0xf]  ;;  %v1598_v40 = vld [vmem:[%s1929_s9 + $0xe8] sm:$0xff]   ;;  %s590_s20 = scalar_lea.vmem %s2065_s3, %s589_s30  ;;  %s1100_s17 = sadd.s32 (%p1775_p9), %s1658_s22, %s1360_s18 }
  0x56   : > { %1449 = vmatpush3.bf16.msra.mxu0 %v1573_v6  ;;  %1410 = vmatprep.subr.bf16.mxu1 %v1676_v0  ;;  %v1321_v15 = vcombine.low %v1958_v12, %v822_v13  ;;  %v613_v20 = vld [vmem:[%s1968_s27] sm:$0xf]  ;;  %v614_v21 = vld [vmem:[%s1968_s27 + $0x4] sm:$0x7]  ;;  %v1600_v43 = vld [vmem:[%s1929_s9 + $0xf0] sm:$0xff]  }
  0x57   : > { %1450 = vmatprep.subr.bf16.mxu0 %v1676_v0  ;;  %v1287_v25 = vcombine.low %v613_v20, %v614_v21  ;;  %v942_v36 = vld [vmem:[%s1968_s27 + $0x4] sm:$0xf]  ;;  %v1601_v46 = vld [vmem:[%s1929_s9 + $0x38] sm:$0xff]   ;;  %v1355_v53 = vld [vmem:[%s590_s20] ss:$0 sm:$0xff]  ;;  %s1361_s27 = sshll.u32 (%p1775_p9), %s1100_s17, 2 }
  0x58   : > { %v846_v17 = vshll.u32 %v1321_v15, 16  ;;  %v844_v22 = vshrl.u32 %v1321_v15, 16  ;;  %v1596_v37 = vld [vmem:[%s1929_s9 + $0xe0] sm:$0xff]   ;;  %v1346_v38 = vcombine.low %v613_v20, %v942_v36  ;;  %v1602_v48 = vld [vmem:[%s1929_s9 + $0xf8] sm:$0xff]   ;;  %s593_s9 = scalar_lea.vmem %s2066_s4, %s589_s30  ;;  %s1102_s7 = scalar_lea.vmem (%p1775_p9), %s2067_s5, %s1361_s27 }
  0x59   : > { %1411 = vmatpush3.bf16.msra.mxu1 %v1574_v7  ;;  %v596_v47 = vld [vmem:[%s1953_s15 + $0x4] sm:$0x7]  ;;  %v1356_v58 = vld [vmem:[%s593_s9] ss:$0 sm:$0xff]  ;;  %s1266_s15 = sshll.u32 %s575_s14, 3 }
  0x5a   : > { %1451 = vmatpush3.bf16.msra.mxu0 %v1575_v8  ;;  %1412 = vmatprep.subr.bf16.mxu1 %v1676_v0  ;;  %v848_v23 = vrot.slane %v846_v17, 1  ;;  %v966_v41 = vshll.u32 %v1346_v38, 16  ;;  %v964_v44 = vshrl.u32 %v1346_v38, 16  ;;  %v1296_v49 = vcombine.low %v1958_v12, %v596_v47  ;;  %s577_s16 = scalar_lea.vmem [#allocation3], %s1266_s15 }
  0x5b   : > { %1452 = vmatprep.subr.bf16.mxu0 %v1676_v0 }
  0x5c   : > { %v849_v27 = vor.u32 %v848_v23, %v844_v22  ;;  %v968_v45 = vrot.slane %v966_v41, 1 }
  0x5d   : > { %1413 = vmatpush3.bf16.msra.mxu1 %v1576_v9 }
  0x5e   : > { %1453 = vmatpush3.bf16.msra.mxu0 %v1577_v10  ;;  %1414 = vmatprep.subr.bf16.mxu1 %v1676_v0  ;;  %v969_v50 = vor.u32 %v968_v45, %v964_v44 }
  0x5f   : > { %1454 = vmatprep.subr.bf16.mxu0 %v1676_v0 }
  0x61   : > { %1415 = vmatpush3.bf16.msra.mxu1 %v1578_v11 }
  0x62   : > { %1455 = vmatpush3.bf16.msra.mxu0 %v1579_v14  ;;  %1416 = vmatprep.subr.bf16.mxu1 %v1676_v0 }
  0x63   : > { %1456 = vmatprep.subr.bf16.mxu0 %v1676_v0 }
  0x65   : > { %1417 = vmatpush3.bf16.msra.mxu1 %v1580_v16 }
  0x66   : > { %1457 = vmatpush3.bf16.msra.mxu0 %v1581_v18  ;;  %1418 = vmatprep.subr.bf16.mxu1 %v1676_v0 }
  0x67   : > { %1458 = vmatprep.subr.bf16.mxu0 %v1676_v0 }
  0x69   : > { %1419 = vmatpush3.bf16.msra.mxu1 %v1582_v19 }
  0x6a   : > { %1459 = vmatpush3.bf16.msra.mxu0 %v1583_v24  ;;  %1424 = vmatprep.subr.bf16.mxu1 %v1676_v0 }
  0x6b   : > { %1464 = vmatprep.subr.bf16.mxu0 %v1676_v0 }
  0x6c   : > { %1421 = vmatmul.mubr.bf16.vlgmr.msra.gmra.mrb[0].mxu1 %v1287_v25 }
  0x6d   : > { %1425 = vmatpush3.bf16.msra.mxu1 %v1586_v26  ;;  %1461 = vmatmul.mubr.bf16.vlgmr.msra.gmra.mrb[0].mxu0 %v849_v27 }
  0x6e   : > { %1465 = vmatpush3.bf16.msra.mxu0 %v1588_v28  ;;  %1426 = vmatprep.subr.bf16.mxu1 %v1676_v0 }
  0x6f   : > { %1466 = vmatprep.subr.bf16.mxu0 %v1676_v0  ;;  %1440 = vmatprep.mubr.msk.bf16.mxu1 %vm1677_vm0, %v1676_v0 }
  0x70   : > { %1480 = vmatprep.mubr.msk.bf16.mxu0 %vm1677_vm0, %v1676_v0 }
  0x71   : > { %1427 = vmatpush3.bf16.msra.mxu1 %v1589_v29 }
  0x72   : > { %1467 = vmatpush3.bf16.msra.mxu0 %v1590_v30  ;;  %1428 = vmatprep.subr.bf16.mxu1 %v1676_v0 }
  0x73   : > { %1468 = vmatprep.subr.bf16.mxu0 %v1676_v0 }
  0x75   : > { %1429 = vmatpush3.bf16.msra.mxu1 %v1591_v31 }
  0x76   : > { %1469 = vmatpush3.bf16.msra.mxu0 %v1592_v32  ;;  %1430 = vmatprep.subr.bf16.mxu1 %v1676_v0 }
  0x77   : > { %1470 = vmatprep.subr.bf16.mxu0 %v1676_v0 }
  0x79   : > { %1431 = vmatpush3.bf16.msra.mxu1 %v1593_v33 }
  0x7a   : > { %1471 = vmatpush3.bf16.msra.mxu0 %v1594_v34  ;;  %1432 = vmatprep.subr.bf16.mxu1 %v1676_v0 }
  0x7b   : > { %1472 = vmatprep.subr.bf16.mxu0 %v1676_v0 }
  0x7d   : > { %1433 = vmatpush3.bf16.msra.mxu1 %v1595_v35 }
  0x7e   : > { %1473 = vmatpush3.bf16.msra.mxu0 %v1596_v37  ;;  %1434 = vmatprep.subr.bf16.mxu1 %v1676_v0 }
  0x7f   : > { %1474 = vmatprep.subr.bf16.mxu0 %v1676_v0 }
  0x81   : > { %1435 = vmatpush3.bf16.msra.mxu1 %v1597_v39 }
  0x82   : > { %1475 = vmatpush3.bf16.msra.mxu0 %v1598_v40  ;;  %1436 = vmatprep.subr.bf16.mxu1 %v1676_v0 }
  0x83   : > { %1476 = vmatprep.subr.bf16.mxu0 %v1676_v0 }
  0x85   : > { %1437 = vmatpush3.bf16.msra.mxu1 %v1599_v42 }
  0x86   : > { %1477 = vmatpush3.bf16.msra.mxu0 %v1600_v43  ;;  %1438 = vmatprep.subr.bf16.mxu1 %v1676_v0 }
  0x87   : > { %1478 = vmatprep.subr.bf16.mxu0 %v1676_v0 }
  0x89   : > { %1439 = vmatpush3.bf16.msra.mxu1 %v1601_v46 }
  0x8a   : > { %1479 = vmatpush3.bf16.msra.mxu0 %v1602_v48 }
  0x8c   : > { %1441 = vmatmul.mubr.bf16.vlgmr.msra.gmra.mrb[0].mxu1 %v1296_v49 }
  0x8d   : > { %1481 = vmatmul.mubr.bf16.vlgmr.msra.gmra.mrb[0].mxu0 %v969_v50 }
 0x15f   : > { %v815_v51 = vpop.f32.mrb[0].mxu1 }
 0x160   : > { %v1053_v52 = vpop.f32.mrb[0].mxu0  ;;  %v1442_v54 = vpop.f32.mrb[1].mxu1 }
 0x161   : > { %v1484_v55 = vadd.f32 %v1053_v52, %v815_v51  ;;  %v1482_v56 = vpop.f32.mrb[1].mxu0  ;;  %v818_v57 = vpop.f32.mrb[2].mxu1 }
 0x162   : > { %v1056_v59 = vpop.f32.mrb[2].mxu0  ;;  %v1443_v60 = vpop.f32.mrb[3].mxu1 }
 0x163   : > { %v1069_v61 = vmul.f32 %v1484_v55, %v1355_v53  ;;  %v1485_v62 = vadd.f32 %v1056_v59, %v818_v57  ;;  %v1483_v63 = vpop.f32.mrb[3].mxu0 }
 0x165   : > { %v1078_v0 = vadd.f32 %v1356_v58, %v1069_v61  ;;  %v1070_v1 = vmul.f32 %v1485_v62, %v1355_v53 }
 0x167   : > { %v1080_v2 = vmax.f32 %v1078_v0, 0.0  ;;  %v1079_v3 = vadd.f32 %v1356_v58, %v1070_v1  ;;  %1098 = sbr.rel (!%p1775_p9) target bundleno = 374 (0x176), region = 85 }
 0x169   : > { %v1366_v4 = vpack.c.bf16 %v1080_v2, %v1080_v2  ;;  %v1081_v5 = vmax.f32 %v1079_v3, 0.0 }
 0x16b   : > { %1090 = vst [vmem:[%s577_s16] sm:$0xf] %v1366_v4  ;;  %v1367_v6 = vpack.c.bf16 %v1081_v5, %v1081_v5 }
 0x16d   : > { %1091 = vst [vmem:[%s577_s16 + $0x4] sm:$0x7] %v1367_v6 }
 0x172   : > { %v1118_v7 = vld [vmem:[%s577_s16] sm:$0xf] }
 0x173   : > { %1119 = vst [vmem:[%s1102_s7] sm:$0xf] %v1118_v7 }
 0x174   : > { %v1120_v8 = vld [vmem:[%s577_s16 + $0x4] sm:$0xf] }
 0x175   : > { %1121 = vst [vmem:[%s1102_s7 + $0x8] sm:$0xf] %v1120_v8 }
 0x176 PF: > { %s15_s26 = sadd.s32 1, %s1674_s26   ;;  %s2069_s18 = smov %s1646_s19 }
 0x177   : > { %p12_p2 = scmp.ge.s32.totalorder %s15_s26, 6   ;;  %s2070_s19 = smov %s1780_s12 }
 0x178   : > { %s2071_s20 = smov %s1654_s21  ;;  %s2072_s21 = smov %s1769_s8 }
 0x179   : > { %s2073_s22 = smov %s1666_s24  ;;  %s2074_s23 = smov %s1670_s25 }
 0x17a   : > { %s2075_s24 = smov %s2078_s28  ;;  %s2076_s25 = smov %s2082_s29 }
 0x17b   :  { %14 = sbr.rel (!%p12_p2) target bundleno = 5 (0x5), region = 172 }

// kernel: cnn_forward.8
= control target key start
LH: loop header
LB: loop body
LE: loop exit
PB: predicated region body
PF: predicated region fallthrough
CT: control target
= control target key end

     0   :  { %s329_s9 = smov 0   ;;  %s353_s0 = inlined_call_operand.vmem [shape: bf16[2,7,256], index: 0, kind: input, shape index: {}]   ;;  %s354_s1 = inlined_call_operand.vmem [shape: bf16[2,7,256], index: 1, kind: input, shape index: {}]   ;;  %s355_s2 = inlined_call_operand.vmem [shape: bf16[2,4,256], index: 2, kind: output, shape index: {}]  }
   0x1 LB: > { %s280_s10 = sadd.s32 4294967295, %s312_s9   ;;  %p284_p0 = scmp.ge.s32.totalorder %s312_s9, 1  ;;  %s312_s9 = sphi %s329_s9, %s12_s9  }
   0x2   : > { %p122_p1 = scmp.lt.s32.totalorder %s312_s9, 3 }
   0x4   : > { %p123_p2 = pnand %p284_p0, %p122_p1 }
   0x5   : > { %p149_p3 = scmp.lt.s32.totalorder (!%p123_p2), %s280_s10, 1 }
   0x6   : > { %126 = sbr.rel (%p123_p2) target bundleno = 35 (0x23), region = 28 }
   0xd   : > { %s357_s10 = smov (!%p149_p3, %s280_s10), 1 }
   0xe   : > { %s295_s11 = sshll.u32 %s357_s10, 3  ;;  %s297_s18 = sshll.u32 %s357_s10, 2 }
   0xf   : > { %s153_s14 = scalar_lea.vmem %s353_s0, %s295_s11  ;;  %s158_s17 = scalar_lea.vmem %s354_s1, %s295_s11 }
  0x10   : > { %v167_v0 = vld [vmem:[%s153_s14] sm:$0x77]  ;;  %s163_s21 = scalar_lea.vmem %s355_s2, %s297_s18 }
  0x11   : > { %v168_v1 = vld [vmem:[%s158_s17] sm:$0x77] }
  0x12   : > { %v169_v2 = vmax.bf16 %v168_v1, %v167_v0  ;;  %v189_v3 = vld [vmem:[%s153_s14] sm:$0xee] }
  0x13   : > { %v190_v4 = vld [vmem:[%s158_s17] sm:$0xee] }
  0x14   : > { %v181_v5 = vld [vmem:[%s153_s14] sm:$0x66]  ;;  %v191_v7 = vmax.bf16 %v190_v4, %v189_v3  ;;  %v171_v8 = vshrl.u32 %v169_v2, 16  ;;  %v174_v9 = vshll.u32 %v169_v2, 16 }
  0x15   : > { %v182_v6 = vld [vmem:[%s158_s17] sm:$0x66] }
  0x16   : > { %v164_v10 = vld [vmem:[%s153_s14] sm:$0x33]  ;;  %v193_v12 = vshrl.u32 %v191_v7, 16  ;;  %v196_v13 = vshll.u32 %v191_v7, 16  ;;  %v173_v14 = vrot.slane %v171_v8, 4  ;;  %v176_v15 = vrot.slane %v174_v9, 5 }
  0x17   : > { %v165_v11 = vld [vmem:[%s158_s17] sm:$0x33]  ;;  %v183_v16 = vmax.bf16 %v182_v6, %v181_v5 }
  0x18   : > { %v195_v17 = vrot.slane %v193_v12, 5  ;;  %v198_v18 = vrot.slane %v196_v13, 6  ;;  %v166_v19 = vmax.bf16 %v165_v11, %v164_v10  ;;  %v177_v20 = vor.u32 %v176_v15, %v173_v14 }
  0x19   : > { %v291_v23 = vrot.slane %v183_v16, 9 }
  0x1a   : > { %v199_v21 = vor.u32 %v198_v18, %v195_v17  ;;  %v178_v22 = vrot.slane %v177_v20, 4 }
  0x1c   : > { %v180_v24 = vmax.bf16 %v178_v22, %v166_v19  ;;  %v200_v25 = vrot.slane %v199_v21, 4 }
  0x1e   : > { %v188_v26 = vmax.bf16 %v291_v23, %v180_v24 }
  0x20   : > { %v202_v27 = vmax.bf16 %v200_v25, %v188_v26 }
  0x22   : > { %292 = vst.sshfl [vmem:[%s163_s21] sm:$0x33 pattern:$0x76325410] %v202_v27 }
  0x23 PF: > { %s12_s9 = sadd.s32 1, %s312_s9  }
  0x24   : > { %p9_p4 = scmp.ge.s32.totalorder %s12_s9, 4  }
  0x26   :  { %11 = sbr.rel (!%p9_p4) target bundleno = 1 (0x1), region = 61 }

// kernel: cnn_forward.9
= control target key start
LH: loop header
LB: loop body
LE: loop exit
PB: predicated region body
PF: predicated region fallthrough
CT: control target
= control target key end

     0   :  { %v21_v0 = vlaneseq  ;;  %v180_v1 = vmov 1983009808   ;;  %vm135_vm0 = vcmask 1041408   ;;  %vm167_vm1 = vcmask 1024   ;;  %s221_s1 = inlined_call_operand.vmem [shape: f32[1,1024], index: 1, kind: input, shape index: {}]   ;;  %s222_s2 = inlined_call_operand.<no memory space> [shape: f32[1,1], index: 2, kind: input, shape index: {}]   ;;  %s223_s0 = inlined_call_operand.vmem [shape: bf16[2,1024], index: 0, kind: input, shape index: {}]   ;;  %s224_s3 = inlined_call_operand.vmem [shape: f32[2,1], index: 3, kind: output, shape index: {}]  }
   0x1   :  { %v56_v2 = vunpack.c.l.s4 %v180_v1  ;;  %v8_v3 = vstv %s222_s2  ;;  %v19_v5 = vld [vmem:[%s221_s1] sm:$0xff] }
   0x2   :  { %v22_v4 = vshrl.u32 %v21_v0, 7  ;;  %9 = vst [vmem:[#allocation2] sm:$0x1] %v8_v3  ;;  %v16_v19 = vld [vmem:[%s223_s0] sm:$0xff] }
   0x3   :  { %v57_v6 = vunpack.c.0.s8 %v56_v2  ;;  %v17_v29 = vunpack.c.l.bf16 %v16_v19  ;;  %v18_v32 = vunpack.c.h.bf16 %v16_v19 }
   0x4   :  { %v23_v7 = vsub.s32 0, %v22_v4  ;;  %v27_v8 = vsub.s32 1, %v22_v4  ;;  %v31_v9 = vsub.s32 2, %v22_v4  ;;  %v35_v10 = vsub.s32 3, %v22_v4 }
   0x5   :  { %v39_v11 = vsub.s32 4, %v22_v4  ;;  %v43_v12 = vsub.s32 5, %v22_v4  ;;  %v47_v13 = vsub.s32 6, %v22_v4  ;;  %v51_v14 = vsub.s32 7, %v22_v4 }
   0x6   :  { %v24_v15 = vrot.slane %v19_v5, %v23_v7  ;;  %v28_v16 = vrot.slane %v19_v5, %v27_v8  ;;  %v32_v17 = vrot.slane %v19_v5, %v31_v9  ;;  %v36_v18 = vrot.slane %v19_v5, %v35_v10 }
   0x7   :  { %v40_v20 = vrot.slane %v19_v5, %v39_v11  ;;  %v44_v21 = vrot.slane %v19_v5, %v43_v12  ;;  %v48_v22 = vrot.slane %v19_v5, %v47_v13  ;;  %v52_v23 = vrot.slane %v19_v5, %v51_v14 }
   0x8   :  { %v53_v24 = vcombine.low %v24_v15, %v28_v16  ;;  %v54_v25 = vcombine.low %v32_v17, %v36_v18  ;;  %v60_v26 = vsub.s32 %v57_v6, %v22_v4 }
   0x9   :  { %v70_v27 = vcombine.low %v40_v20, %v44_v21  ;;  %v71_v28 = vcombine.low %v48_v22, %v52_v23  ;;  %v173_v0 = vld [vmem:[#allocation2] ss:$0 sm:$0xff] }
   0xa   :  { %v61_v30 = vrot.slane %v53_v24, %v60_v26  ;;  %v68_v31 = vrot.slane %v54_v25, %v60_v26 }
   0xb   :  { %v78_v33 = vrot.slane %v70_v27, %v60_v26  ;;  %v85_v34 = vrot.slane %v71_v28, %v60_v26 }
   0xc   :  { %v69_v35 = vcombine.low %v61_v30, %v68_v31 }
   0xd   :  { %v86_v36 = vcombine.low %v78_v33, %v85_v34 }
   0xe   :  { %v89_v37 = vmul.f32 %v69_v35, %v17_v29 }
   0xf   :  { %v90_v38 = vmul.f32 %v86_v36, %v18_v32 }
  0x10   :  { %v93_v39 = vcombine.high %v89_v37, %v89_v37  ;;  %v100_v40 = vrot.slane %v89_v37, %v60_v26 }
  0x11   :  { %v110_v41 = vcombine.high %v90_v38, %v90_v38  ;;  %v117_v44 = vrot.slane %v90_v38, %v60_v26 }
  0x12   :  { %v107_v42 = vrot.slane %v93_v39, %v60_v26  ;;  %v108_v43 = vcombine.high %v100_v40, %v100_v40  ;;  %v136_v45 = vsel %vm135_vm0, %v100_v40, 0.0 }
  0x13   :  { %v124_v50 = vrot.slane %v110_v41, %v60_v26  ;;  %v125_v51 = vcombine.high %v117_v44, %v117_v44  ;;  %v143_v54 = vsel %vm135_vm0, %v117_v44, 0.0 }
  0x14   :  { %v109_v46 = vcombine.high %v107_v42, %v107_v42  ;;  %v137_v47 = vsel %vm135_vm0, %v108_v43, 0.0  ;;  %v139_v48 = vsel %vm135_vm0, %v107_v42, 0.0 }
  0x15   :  { %v138_v49 = vadd.f32 %v137_v47, %v136_v45  ;;  %v126_v56 = vcombine.high %v124_v50, %v124_v50  ;;  %v145_v57 = vsel %vm135_vm0, %v125_v51, 0.0  ;;  %v147_v59 = vsel %vm135_vm0, %v124_v50, 0.0 }
  0x16   :  { %v141_v52 = vsel %vm135_vm0, %v109_v46, 0.0 }
  0x17   :  { %v140_v53 = vadd.f32 %v139_v48, %v138_v49  ;;  %v149_v61 = vsel %vm135_vm0, %v126_v56, 0.0 }
  0x19   :  { %v142_v55 = vadd.f32 %v141_v52, %v140_v53 }
  0x1b   :  { %v144_v58 = vadd.f32 %v143_v54, %v142_v55 }
  0x1d   :  { %v146_v60 = vadd.f32 %v145_v57, %v144_v58 }
  0x1f   :  { %v148_v62 = vadd.f32 %v147_v59, %v146_v60 }
  0x21   :  { %v150_v63 = vadd.f32 %v149_v61, %v148_v62 }
  0x23   :  { %151 = vadd.xlane.f32.xlu0 %v150_v63 }
  0xb0   :  { %v152_v1 = vpop.xlane.xlu0 %151 }
  0xb1   :  { %v160_v2 = vadd.f32 %v173_v0, %v152_v1 }
  0xb3   :  { %v174_v3 = vmul.f32 -1.442695, %v160_v2 }
  0xb5   :  { %176 = vpow2.f32 %v174_v3 }
  0xbf   :  { %v177_v4 = vpop.eup %176 }
  0xc0   :  { %v164_v5 = vadd.f32 1.0, %v177_v4 }
  0xc2   :  { %178 = vrcp.f32 %v164_v5 }
  0xcc   :  { %v179_v6 = vpop.eup %178 }
  0xcd   :  { %168 = vst.msk [vmem:[%s224_s3] sm:$0x3] %vm167_vm1, %v179_v6 }

</bundles_post_ra>
